<compile_context>
chip_gen: v6e
topology: v6e:2x2x1
jax: 0.10.0
libtpu: 0.0.40
codegen_flags: <defaults>
</compile_context>

<pallas_src>
import jax
import jax.numpy as jnp
from jax.experimental import pallas as pl
from jax.experimental.pallas import tpu as pltpu

# ----------------------------- problem sizes --------------------------------
B = 2          # batch
V = 512        # vocab size (lane-aligned)
DEC = 256      # decoder_state_dim
EMB = 64       # embedding_dim
HID = 32       # hidden width of pointer_net / p_gen_net
THRESHOLD = 0.5
NUM_BIAS = 64  # number of synthetic biasing subwords


# ------------------------------- kernel -------------------------------------
def tcpgen_kernel(logits_ref, dec_t_ref, emb_t_ref, mask_ref,
                  wf_t_ref, w1e_t_ref, packed_ref, out_ref):
    # packed_ref layout ([HID, 128] f32):
    #   [:, 0]        b1   (column)
    #   [:, 1]        bg1  (column)
    #   [0, 2:2+HID]  w2   (row)
    #   [1, 2:2+HID]  wg2  (row)
    #   [2, 2]        b2   (scalar)
    #   [2, 3]        bg2  (scalar)
    b1_col = packed_ref[:, 0:1]                                     # [HID, 1]
    bg1_col = packed_ref[:, 1:2]                                    # [HID, 1]
    w2_row = packed_ref[0:1, 2:2 + HID]                             # [1, HID]
    wg2_row = packed_ref[1:2, 2:2 + HID]                            # [1, HID]
    b2 = packed_ref[2:3, 2:3]                                       # [1, 1]
    bg2 = packed_ref[2:3, 3:4]                                      # [1, 1]

    # --- softmax over original logits (V on lanes) ----------------------
    logits = logits_ref[...]                                        # [B, V]
    m = jnp.max(logits, axis=-1, keepdims=True)
    e = jnp.exp(logits - m)
    inv = pl.reciprocal(jnp.sum(e, axis=-1, keepdims=True), approx=True)
    orig_probs = e * inv                                            # [B, V]

    # --- fused decoder-side matmul (pointer h_dec + p_gen hidden) -------
    # wf_t = concat([w1_dec, wg1], axis=1).T : [2*HID, DEC];  dec_t : [DEC, B]
    dec_out = jnp.dot(wf_t_ref[...], dec_t_ref[...],
                      preferred_element_type=jnp.float32)           # [2*HID, B]
    h_dec_t = dec_out[:HID, :]                                      # [HID, B]
    hg_pre_t = dec_out[HID:, :]                                     # [HID, B]

    # --- p_gen net: ReLU -> Linear(HID->1) -> sigmoid (tiny) ------------
    hg_t = jnp.maximum(hg_pre_t + bg1_col, 0.0)                     # [HID, B]
    g = jnp.dot(wg2_row, hg_t, preferred_element_type=jnp.float32) + bg2  # [1, B]
    p_gen = jax.nn.sigmoid(g)                                       # [1, B]

    # --- pointer-net embedding half: MXU, V=512 output lanes ------------
    # h_emb_t[j, v] = (emb @ w1_emb)[v, j]
    h_emb_t = jnp.dot(w1e_t_ref[...], emb_t_ref[...],
                      preferred_element_type=jnp.float32)           # [HID, V]

    mask = mask_ref[...]                                            # [B, V]
    neg = jnp.float32(-1e30)

    # --- per-batch (B=2, fully unrolled) scores, masked softmax, mix ----
    for b in range(B):
        # ReLU block: [HID, V], fully dense on lanes.
        hb = jnp.maximum(h_dec_t[:, b:b + 1] + h_emb_t + b1_col, 0.0)   # [HID, V]
        # Linear(HID -> 1) as an MXU matmul over the HID contraction.
        score = jnp.dot(w2_row, hb,
                        preferred_element_type=jnp.float32) + b2        # [1, V]

        mask_row = mask[b:b + 1, :]                                     # [1, V]
        orig_row = orig_probs[b:b + 1, :]                               # [1, V]

        # masked softmax over trie-valid tokens
        masked = jnp.where(mask_row > 0, score, neg)
        sm = jnp.max(masked, axis=-1, keepdims=True)
        pe = jnp.where(mask_row > 0, jnp.exp(masked - sm), 0.0)
        denom = jnp.sum(pe, axis=-1, keepdims=True)                     # [1, 1]
        p_soft = pe * pl.reciprocal(jnp.maximum(denom, 1e-30), approx=True)
        # no valid trie continuation (denom == 0) -> fall back to orig probs
        p_dist = jnp.where(denom > 0.0, p_soft, orig_row)               # [1, V]

        pg = p_gen[0:1, b:b + 1]                                        # [1, 1]
        biased = pg * p_dist + (1.0 - pg) * orig_row
        mass = jnp.sum(p_dist, axis=-1, keepdims=True)
        final = jnp.where(mass < THRESHOLD, orig_row, biased)
        out_ref[b:b + 1, :] = jnp.log(final + 1e-8)


# ------------------------------ wrapper --------------------------------------
def _pack_params(p):
    """Host-side packing: fuse dec-side weights, pre-transpose, pack small vecs."""
    wf_t = jnp.concatenate([p["w1_dec"], p["wg1"]], axis=1).T        # [2*HID, DEC]
    w1e_t = p["w1_emb"].T                                            # [HID, EMB]
    packed = jnp.zeros((HID, 128), jnp.float32)
    packed = packed.at[:, 0].set(p["b1"].reshape(HID))
    packed = packed.at[:, 1].set(p["bg1"].reshape(HID))
    packed = packed.at[0, 2:2 + HID].set(p["w2"].reshape(HID))
    packed = packed.at[1, 2:2 + HID].set(p["wg2"].reshape(HID))
    packed = packed.at[2, 2].set(p["b2"][0, 0])
    packed = packed.at[2, 3].set(p["bg2"][0, 0])
    return wf_t, w1e_t, packed


@jax.jit
def tcpgen_forward(logits, decoder_state, emb_table, valid_mask, p):
    wf_t, w1e_t, packed = _pack_params(p)
    dec_t = decoder_state.T                                          # [DEC, B]
    emb_t = emb_table.T                                              # [EMB, V]

    vmem = pl.BlockSpec(memory_space=pltpu.MemorySpace.VMEM)
    args = (logits, dec_t, emb_t, valid_mask, wf_t, w1e_t, packed)
    return pl.pallas_call(
        tcpgen_kernel,
        out_shape=jax.ShapeDtypeStruct((B, V), jnp.float32),
        in_specs=[vmem] * len(args),
        out_specs=vmem,
    )(*args)


# -------------------------- plain-JAX reference ------------------------------
def tcpgen_reference(logits, dec, emb, mask, p):
    orig = jax.nn.softmax(logits, axis=-1)
    h_dec = dec @ p["w1_dec"]                                        # [B, HID]
    h_emb = emb @ p["w1_emb"]                                        # [V, HID]
    h = jax.nn.relu(h_dec[:, None, :] + h_emb[None, :, :] + p["b1"][None, :, :])
    scores = jnp.sum(h * p["w2"][None, :, :], axis=-1) + p["b2"]
    masked = jnp.where(mask > 0, scores, -1e30)
    sm = jnp.max(masked, axis=-1, keepdims=True)
    pe = jnp.where(mask > 0, jnp.exp(masked - sm), 0.0)
    denom = jnp.sum(pe, axis=-1, keepdims=True)
    pointer_soft = pe / jnp.maximum(denom, 1e-30)
    pointer_dist = jnp.where(denom > 0, pointer_soft, orig)
    hg = jax.nn.relu(dec @ p["wg1"] + p["bg1"])
    p_gen = jax.nn.sigmoid(jnp.sum(hg * p["wg2"], axis=-1, keepdims=True) + p["bg2"])
    biased = p_gen * pointer_dist + (1.0 - p_gen) * orig
    mass = jnp.sum(pointer_dist, axis=-1, keepdims=True)
    final = jnp.where(mass < THRESHOLD, orig, biased)
    return jnp.log(final + 1e-8)


# -------------------------------- main ---------------------------------------
if __name__ == "__main__":
    key = jax.random.PRNGKey(0)
    keys = jax.random.split(key, 12)

    # forward inputs
    original_logits = jax.random.normal(keys[0], (B, V), jnp.float32)
    decoder_state = jax.random.normal(keys[1], (B, DEC), jnp.float32)
    prefix = jax.random.randint(keys[2], (B, 4), 0, V)  # host-side only (trie lookup)

    # ----- host-side stand-in for trie / tokenizer / biasing lists -----------
    # TODO(synk): Trie traversal, WhisperTokenizer and biasing-file parsing are
    # host-side Python with no Pallas equivalent; we synthesize their results.
    bias_token_ids = (jnp.arange(NUM_BIAS) * 7 + 3) % V
    bias_embedding_weight = jax.random.normal(keys[3], (NUM_BIAS, EMB), jnp.float32)
    # dense per-vocab embedding table (zeros for non-bias tokens), like _get_bias_embedding
    emb_table = jnp.zeros((V, EMB), jnp.float32).at[bias_token_ids].set(bias_embedding_weight)
    # batch 0: trie proposes all bias tokens as valid continuations;
    # batch 1: trie returns nothing -> exercises the "no valid ids" branch.
    valid_mask = jnp.zeros((B, V), jnp.float32).at[0, bias_token_ids].set(1.0)

    # ----- deterministic parameters (shapes from TCPGen.__init__) ------------
    def init(k, shape, scale=0.05):
        return scale * jax.random.normal(k, shape, jnp.float32)

    params = {
        # pointer_net: Linear(DEC+EMB, 32) split into dec/emb halves, then Linear(32, 1)
        "w1_dec": init(keys[4], (DEC, HID)),
        "w1_emb": init(keys[5], (EMB, HID)),
        "b1":     init(keys[6], (1, HID)),
        "w2":     init(keys[7], (1, HID)),     # Linear(32,1) weight, stored as a row
        "b2":     init(keys[8], (1, 1)),
        # p_gen_net: Linear(DEC, 32) -> ReLU -> Linear(32, 1) -> Sigmoid
        "wg1":    init(keys[9], (DEC, HID)),
        "bg1":    init(keys[10], (1, HID)),
        "wg2":    init(keys[11], (1, HID)),
        "bg2":    jnp.zeros((1, 1), jnp.float32),
    }

    out = tcpgen_forward(original_logits, decoder_state, emb_table,
                         valid_mask, params)
    out = jax.block_until_ready(out)

    # correctness check against a pure-JAX reference of the same math
    ref = tcpgen_reference(original_logits, decoder_state, emb_table,
                           valid_mask, params)
    assert out.shape == (B, V)
    assert bool(jnp.all(jnp.isfinite(out)))
    # approx reciprocal (EUP) introduces ~1e-4-level relative error on the probs
    assert bool(jnp.max(jnp.abs(out - ref)) < 5e-3)

    print("KERNEL_OK")
</pallas_src>

<mosaic_0001>
module attributes {stable_mosaic.version = 11 : i64} {
  func.func @tcpgen_kernel(%arg0: memref<2x512xf32, #tpu.memory_space<vmem>>, %arg1: memref<256x2xf32, #tpu.memory_space<vmem>>, %arg2: memref<64x512xf32, #tpu.memory_space<vmem>>, %arg3: memref<2x512xf32, #tpu.memory_space<vmem>>, %arg4: memref<64x256xf32, #tpu.memory_space<vmem>>, %arg5: memref<32x64xf32, #tpu.memory_space<vmem>>, %arg6: memref<32x128xf32, #tpu.memory_space<vmem>>, %arg7: memref<2x512xf32, #tpu.memory_space<vmem>>) attributes {dimension_semantics = [], scalar_prefetch = 0 : i64, scratch_operands = 0 : i64, tpu.core_type = #tpu.core_type<tc>} {
    %c0 = arith.constant 0 : index
    %c0_0 = arith.constant 0 : index
    %0 = vector.load %arg6[%c0, %c0_0] : memref<32x128xf32, #tpu.memory_space<vmem>>, vector<32x1xf32>
    %c0_1 = arith.constant 0 : index
    %c1 = arith.constant 1 : index
    %1 = vector.load %arg6[%c0_1, %c1] : memref<32x128xf32, #tpu.memory_space<vmem>>, vector<32x1xf32>
    %c0_2 = arith.constant 0 : index
    %c2 = arith.constant 2 : index
    %2 = vector.load %arg6[%c0_2, %c2] : memref<32x128xf32, #tpu.memory_space<vmem>>, vector<1x32xf32>
    %c1_3 = arith.constant 1 : index
    %c2_4 = arith.constant 2 : index
    %3 = vector.load %arg6[%c1_3, %c2_4] : memref<32x128xf32, #tpu.memory_space<vmem>>, vector<1x32xf32>
    %c2_5 = arith.constant 2 : index
    %c2_6 = arith.constant 2 : index
    %4 = vector.load %arg6[%c2_5, %c2_6] : memref<32x128xf32, #tpu.memory_space<vmem>>, vector<1x1xf32>
    %c2_7 = arith.constant 2 : index
    %c3 = arith.constant 3 : index
    %5 = vector.load %arg6[%c2_7, %c3] : memref<32x128xf32, #tpu.memory_space<vmem>>, vector<1x1xf32>
    %c0_8 = arith.constant 0 : index
    %c0_9 = arith.constant 0 : index
    %6 = vector.load %arg0[%c0_8, %c0_9] : memref<2x512xf32, #tpu.memory_space<vmem>>, vector<2x512xf32>
    %cst = arith.constant dense<0xFF800000> : vector<2xf32>
    %7 = vector.multi_reduction <maximumf>, %6, %cst [1] : vector<2x512xf32> to vector<2xf32>
    %8 = vector.shape_cast %7 : vector<2xf32> to vector<2x1xf32>
    %9 = vector.broadcast %8 : vector<2x1xf32> to vector<2x512xf32>
    %10 = arith.subf %6, %9 : vector<2x512xf32>
    %11 = math.exp %10 : vector<2x512xf32>
    %cst_10 = arith.constant dense<0.000000e+00> : vector<2xf32>
    %12 = vector.multi_reduction <add>, %11, %cst_10 [1] : vector<2x512xf32> to vector<2xf32>
    %13 = vector.shape_cast %12 : vector<2xf32> to vector<2x1xf32>
    %14 = tpu.reciprocal %13 {approx = true} : vector<2x1xf32> -> vector<2x1xf32>
    %15 = vector.broadcast %14 : vector<2x1xf32> to vector<2x512xf32>
    %16 = arith.mulf %11, %15 : vector<2x512xf32>
    %c0_11 = arith.constant 0 : index
    %c0_12 = arith.constant 0 : index
    %17 = vector.load %arg4[%c0_11, %c0_12] : memref<64x256xf32, #tpu.memory_space<vmem>>, vector<64x256xf32>
    %c0_13 = arith.constant 0 : index
    %c0_14 = arith.constant 0 : index
    %18 = vector.load %arg1[%c0_13, %c0_14] : memref<256x2xf32, #tpu.memory_space<vmem>>, vector<256x2xf32>
    %cst_15 = arith.constant dense<0.000000e+00> : vector<64x2xf32>
    %19 = tpu.matmul %17, %18, %cst_15 {dimension_numbers = #tpu.dot_dimension_numbers<[1], [0], [0], [1], [0, 0, 1, 1], [], []>} : vector<64x256xf32>, vector<256x2xf32>, vector<64x2xf32> -> vector<64x2xf32>
    %20 = vector.extract_strided_slice %19 {offsets = [0, 0], sizes = [32, 2], strides = [1, 1]} : vector<64x2xf32> to vector<32x2xf32>
    %21 = vector.extract_strided_slice %19 {offsets = [32, 0], sizes = [32, 2], strides = [1, 1]} : vector<64x2xf32> to vector<32x2xf32>
    %22 = vector.broadcast %1 : vector<32x1xf32> to vector<32x2xf32>
    %23 = arith.addf %21, %22 : vector<32x2xf32>
    %cst_16 = arith.constant 0.000000e+00 : f32
    %24 = vector.broadcast %cst_16 : f32 to vector<32x2xf32>
    %25 = arith.maximumf %23, %24 : vector<32x2xf32>
    %cst_17 = arith.constant dense<0.000000e+00> : vector<1x2xf32>
    %26 = tpu.matmul %3, %25, %cst_17 {dimension_numbers = #tpu.dot_dimension_numbers<[1], [0], [0], [1], [0, 0, 1, 1], [], []>} : vector<1x32xf32>, vector<32x2xf32>, vector<1x2xf32> -> vector<1x2xf32>
    %27 = vector.broadcast %5 : vector<1x1xf32> to vector<1x2xf32>
    %28 = arith.addf %26, %27 : vector<1x2xf32>
    %29 = arith.negf %28 : vector<1x2xf32>
    %30 = math.exp %29 : vector<1x2xf32>
    %cst_18 = arith.constant 1.000000e+00 : f32
    %31 = vector.broadcast %cst_18 : f32 to vector<1x2xf32>
    %32 = arith.addf %31, %30 : vector<1x2xf32>
    %33 = arith.divf %31, %32 : vector<1x2xf32>
    %c0_19 = arith.constant 0 : index
    %c0_20 = arith.constant 0 : index
    %34 = vector.load %arg5[%c0_19, %c0_20] : memref<32x64xf32, #tpu.memory_space<vmem>>, vector<32x64xf32>
    %c0_21 = arith.constant 0 : index
    %c0_22 = arith.constant 0 : index
    %35 = vector.load %arg2[%c0_21, %c0_22] : memref<64x512xf32, #tpu.memory_space<vmem>>, vector<64x512xf32>
    %cst_23 = arith.constant dense<0.000000e+00> : vector<32x512xf32>
    %36 = tpu.matmul %34, %35, %cst_23 {dimension_numbers = #tpu.dot_dimension_numbers<[1], [0], [0], [1], [0, 0, 1, 1], [], []>} : vector<32x64xf32>, vector<64x512xf32>, vector<32x512xf32> -> vector<32x512xf32>
    %c0_24 = arith.constant 0 : index
    %c0_25 = arith.constant 0 : index
    %37 = vector.load %arg3[%c0_24, %c0_25] : memref<2x512xf32, #tpu.memory_space<vmem>>, vector<2x512xf32>
    %38 = vector.extract_strided_slice %20 {offsets = [0, 0], sizes = [32, 1], strides = [1, 1]} : vector<32x2xf32> to vector<32x1xf32>
    %39 = vector.broadcast %38 : vector<32x1xf32> to vector<32x512xf32>
    %40 = arith.addf %39, %36 : vector<32x512xf32>
    %41 = vector.broadcast %0 : vector<32x1xf32> to vector<32x512xf32>
    %42 = arith.addf %40, %41 : vector<32x512xf32>
    %cst_26 = arith.constant 0.000000e+00 : f32
    %43 = vector.broadcast %cst_26 : f32 to vector<32x512xf32>
    %44 = arith.maximumf %42, %43 : vector<32x512xf32>
    %cst_27 = arith.constant dense<0.000000e+00> : vector<1x512xf32>
    %45 = tpu.matmul %2, %44, %cst_27 {dimension_numbers = #tpu.dot_dimension_numbers<[1], [0], [0], [1], [0, 0, 1, 1], [], []>} : vector<1x32xf32>, vector<32x512xf32>, vector<1x512xf32> -> vector<1x512xf32>
    %46 = vector.broadcast %4 : vector<1x1xf32> to vector<1x512xf32>
    %47 = arith.addf %45, %46 : vector<1x512xf32>
    %48 = vector.extract_strided_slice %37 {offsets = [0, 0], sizes = [1, 512], strides = [1, 1]} : vector<2x512xf32> to vector<1x512xf32>
    %49 = vector.extract_strided_slice %16 {offsets = [0, 0], sizes = [1, 512], strides = [1, 1]} : vector<2x512xf32> to vector<1x512xf32>
    %cst_28 = arith.constant 0.000000e+00 : f32
    %50 = vector.broadcast %cst_28 : f32 to vector<1x512xf32>
    %51 = arith.cmpf ogt, %48, %50 : vector<1x512xf32>
    %cst_29 = arith.constant -1.000000e+30 : f32
    %52 = vector.broadcast %cst_29 : f32 to vector<1x512xf32>
    %53 = arith.select %51, %47, %52 : vector<1x512xi1>, vector<1x512xf32>
    %cst_30 = arith.constant dense<0xFF800000> : vector<1xf32>
    %54 = vector.multi_reduction <maximumf>, %53, %cst_30 [1] : vector<1x512xf32> to vector<1xf32>
    %55 = vector.shape_cast %54 : vector<1xf32> to vector<1x1xf32>
    %cst_31 = arith.constant 0.000000e+00 : f32
    %56 = vector.broadcast %cst_31 : f32 to vector<1x512xf32>
    %57 = arith.cmpf ogt, %48, %56 : vector<1x512xf32>
    %58 = vector.broadcast %55 : vector<1x1xf32> to vector<1x512xf32>
    %59 = arith.subf %53, %58 : vector<1x512xf32>
    %60 = math.exp %59 : vector<1x512xf32>
    %cst_32 = arith.constant 0.000000e+00 : f32
    %61 = vector.broadcast %cst_32 : f32 to vector<1x512xf32>
    %62 = arith.select %57, %60, %61 : vector<1x512xi1>, vector<1x512xf32>
    %cst_33 = arith.constant dense<0.000000e+00> : vector<1xf32>
    %63 = vector.multi_reduction <add>, %62, %cst_33 [1] : vector<1x512xf32> to vector<1xf32>
    %64 = vector.shape_cast %63 : vector<1xf32> to vector<1x1xf32>
    %cst_34 = arith.constant 1.000000e-30 : f32
    %65 = vector.broadcast %cst_34 : f32 to vector<1x1xf32>
    %66 = arith.maximumf %64, %65 : vector<1x1xf32>
    %67 = tpu.reciprocal %66 {approx = true} : vector<1x1xf32> -> vector<1x1xf32>
    %68 = vector.broadcast %67 : vector<1x1xf32> to vector<1x512xf32>
    %69 = arith.mulf %62, %68 : vector<1x512xf32>
    %cst_35 = arith.constant 0.000000e+00 : f32
    %70 = vector.broadcast %cst_35 : f32 to vector<1x1xf32>
    %71 = arith.cmpf ogt, %64, %70 : vector<1x1xf32>
    %72 = vector.shape_cast %71 : vector<1x1xi1> to vector<1x1xi1>
    %73 = vector.broadcast %72 : vector<1x1xi1> to vector<1x512xi1>
    %74 = arith.select %73, %69, %49 : vector<1x512xi1>, vector<1x512xf32>
    %75 = vector.extract_strided_slice %33 {offsets = [0, 0], sizes = [1, 1], strides = [1, 1]} : vector<1x2xf32> to vector<1x1xf32>
    %76 = vector.broadcast %75 : vector<1x1xf32> to vector<1x512xf32>
    %77 = arith.mulf %76, %74 : vector<1x512xf32>
    %cst_36 = arith.constant 1.000000e+00 : f32
    %78 = vector.broadcast %cst_36 : f32 to vector<1x1xf32>
    %79 = arith.subf %78, %75 : vector<1x1xf32>
    %80 = vector.broadcast %79 : vector<1x1xf32> to vector<1x512xf32>
    %81 = arith.mulf %80, %49 : vector<1x512xf32>
    %82 = arith.addf %77, %81 : vector<1x512xf32>
    %cst_37 = arith.constant dense<0.000000e+00> : vector<1xf32>
    %83 = vector.multi_reduction <add>, %74, %cst_37 [1] : vector<1x512xf32> to vector<1xf32>
    %84 = vector.shape_cast %83 : vector<1xf32> to vector<1x1xf32>
    %cst_38 = arith.constant 5.000000e-01 : f32
    %85 = vector.broadcast %cst_38 : f32 to vector<1x1xf32>
    %86 = arith.cmpf olt, %84, %85 : vector<1x1xf32>
    %87 = vector.shape_cast %86 : vector<1x1xi1> to vector<1x1xi1>
    %88 = vector.broadcast %87 : vector<1x1xi1> to vector<1x512xi1>
    %89 = arith.select %88, %49, %82 : vector<1x512xi1>, vector<1x512xf32>
    %cst_39 = arith.constant 9.99999993E-9 : f32
    %90 = vector.broadcast %cst_39 : f32 to vector<1x512xf32>
    %91 = arith.addf %89, %90 : vector<1x512xf32>
    %92 = math.log %91 : vector<1x512xf32>
    %c0_40 = arith.constant 0 : index
    %c0_41 = arith.constant 0 : index
    %93 = vector.load %arg7[%c0_40, %c0_41] : memref<2x512xf32, #tpu.memory_space<vmem>>, vector<1x512xf32>
    tpu.vector_store %arg7[%c0_40, %c0_41], %92 {strides = array<i32>} : memref<2x512xf32, #tpu.memory_space<vmem>>, vector<1x512xf32>,
    %94 = vector.extract_strided_slice %20 {offsets = [0, 1], sizes = [32, 1], strides = [1, 1]} : vector<32x2xf32> to vector<32x1xf32>
    %95 = vector.broadcast %94 : vector<32x1xf32> to vector<32x512xf32>
    %96 = arith.addf %95, %36 : vector<32x512xf32>
    %97 = vector.broadcast %0 : vector<32x1xf32> to vector<32x512xf32>
    %98 = arith.addf %96, %97 : vector<32x512xf32>
    %cst_42 = arith.constant 0.000000e+00 : f32
    %99 = vector.broadcast %cst_42 : f32 to vector<32x512xf32>
    %100 = arith.maximumf %98, %99 : vector<32x512xf32>
    %cst_43 = arith.constant dense<0.000000e+00> : vector<1x512xf32>
    %101 = tpu.matmul %2, %100, %cst_43 {dimension_numbers = #tpu.dot_dimension_numbers<[1], [0], [0], [1], [0, 0, 1, 1], [], []>} : vector<1x32xf32>, vector<32x512xf32>, vector<1x512xf32> -> vector<1x512xf32>
    %102 = vector.broadcast %4 : vector<1x1xf32> to vector<1x512xf32>
    %103 = arith.addf %101, %102 : vector<1x512xf32>
    %104 = vector.extract_strided_slice %37 {offsets = [1, 0], sizes = [1, 512], strides = [1, 1]} : vector<2x512xf32> to vector<1x512xf32>
    %105 = vector.extract_strided_slice %16 {offsets = [1, 0], sizes = [1, 512], strides = [1, 1]} : vector<2x512xf32> to vector<1x512xf32>
    %cst_44 = arith.constant 0.000000e+00 : f32
    %106 = vector.broadcast %cst_44 : f32 to vector<1x512xf32>
    %107 = arith.cmpf ogt, %104, %106 : vector<1x512xf32>
    %cst_45 = arith.constant -1.000000e+30 : f32
    %108 = vector.broadcast %cst_45 : f32 to vector<1x512xf32>
    %109 = arith.select %107, %103, %108 : vector<1x512xi1>, vector<1x512xf32>
    %cst_46 = arith.constant dense<0xFF800000> : vector<1xf32>
    %110 = vector.multi_reduction <maximumf>, %109, %cst_46 [1] : vector<1x512xf32> to vector<1xf32>
    %111 = vector.shape_cast %110 : vector<1xf32> to vector<1x1xf32>
    %cst_47 = arith.constant 0.000000e+00 : f32
    %112 = vector.broadcast %cst_47 : f32 to vector<1x512xf32>
    %113 = arith.cmpf ogt, %104, %112 : vector<1x512xf32>
    %114 = vector.broadcast %111 : vector<1x1xf32> to vector<1x512xf32>
    %115 = arith.subf %109, %114 : vector<1x512xf32>
    %116 = math.exp %115 : vector<1x512xf32>
    %cst_48 = arith.constant 0.000000e+00 : f32
    %117 = vector.broadcast %cst_48 : f32 to vector<1x512xf32>
    %118 = arith.select %113, %116, %117 : vector<1x512xi1>, vector<1x512xf32>
    %cst_49 = arith.constant dense<0.000000e+00> : vector<1xf32>
    %119 = vector.multi_reduction <add>, %118, %cst_49 [1] : vector<1x512xf32> to vector<1xf32>
    %120 = vector.shape_cast %119 : vector<1xf32> to vector<1x1xf32>
    %cst_50 = arith.constant 1.000000e-30 : f32
    %121 = vector.broadcast %cst_50 : f32 to vector<1x1xf32>
    %122 = arith.maximumf %120, %121 : vector<1x1xf32>
    %123 = tpu.reciprocal %122 {approx = true} : vector<1x1xf32> -> vector<1x1xf32>
    %124 = vector.broadcast %123 : vector<1x1xf32> to vector<1x512xf32>
    %125 = arith.mulf %118, %124 : vector<1x512xf32>
    %cst_51 = arith.constant 0.000000e+00 : f32
    %126 = vector.broadcast %cst_51 : f32 to vector<1x1xf32>
    %127 = arith.cmpf ogt, %120, %126 : vector<1x1xf32>
    %128 = vector.shape_cast %127 : vector<1x1xi1> to vector<1x1xi1>
    %129 = vector.broadcast %128 : vector<1x1xi1> to vector<1x512xi1>
    %130 = arith.select %129, %125, %105 : vector<1x512xi1>, vector<1x512xf32>
    %131 = vector.extract_strided_slice %33 {offsets = [0, 1], sizes = [1, 1], strides = [1, 1]} : vector<1x2xf32> to vector<1x1xf32>
    %132 = vector.broadcast %131 : vector<1x1xf32> to vector<1x512xf32>
    %133 = arith.mulf %132, %130 : vector<1x512xf32>
    %cst_52 = arith.constant 1.000000e+00 : f32
    %134 = vector.broadcast %cst_52 : f32 to vector<1x1xf32>
    %135 = arith.subf %134, %131 : vector<1x1xf32>
    %136 = vector.broadcast %135 : vector<1x1xf32> to vector<1x512xf32>
    %137 = arith.mulf %136, %105 : vector<1x512xf32>
    %138 = arith.addf %133, %137 : vector<1x512xf32>
    %cst_53 = arith.constant dense<0.000000e+00> : vector<1xf32>
    %139 = vector.multi_reduction <add>, %130, %cst_53 [1] : vector<1x512xf32> to vector<1xf32>
    %140 = vector.shape_cast %139 : vector<1xf32> to vector<1x1xf32>
    %cst_54 = arith.constant 5.000000e-01 : f32
    %141 = vector.broadcast %cst_54 : f32 to vector<1x1xf32>
    %142 = arith.cmpf olt, %140, %141 : vector<1x1xf32>
    %143 = vector.shape_cast %142 : vector<1x1xi1> to vector<1x1xi1>
    %144 = vector.broadcast %143 : vector<1x1xi1> to vector<1x512xi1>
    %145 = arith.select %144, %105, %138 : vector<1x512xi1>, vector<1x512xf32>
    %cst_55 = arith.constant 9.99999993E-9 : f32
    %146 = vector.broadcast %cst_55 : f32 to vector<1x512xf32>
    %147 = arith.addf %145, %146 : vector<1x512xf32>
    %148 = math.log %147 : vector<1x512xf32>
    %c1_56 = arith.constant 1 : index
    %c0_57 = arith.constant 0 : index
    %149 = vector.load %arg7[%c1_56, %c0_57] : memref<2x512xf32, #tpu.memory_space<vmem>>, vector<1x512xf32>
    tpu.vector_store %arg7[%c1_56, %c0_57], %148 {strides = array<i32>} : memref<2x512xf32, #tpu.memory_space<vmem>>, vector<1x512xf32>,
    return
  }
}

</mosaic_0001>

<bundles_post_ra>
// kernel: tcpgen_forward.1
= control target key start
LH: loop header
LB: loop body
LE: loop exit
PB: predicated region body
PF: predicated region fallthrough
CT: control target
= control target key end

     0   :  { %v1741_v4 = vmov 1   ;;  %s2452_s0 = inlined_call_operand.vmem [shape: f32[2,512], index: 0, kind: input, shape index: {}]   ;;  %s2453_s1 = inlined_call_operand.vmem [shape: f32[256,2], index: 1, kind: input, shape index: {}]   ;;  %s2454_s2 = inlined_call_operand.vmem [shape: f32[64,512], index: 2, kind: input, shape index: {}]   ;;  %s2455_s3 = inlined_call_operand.vmem [shape: f32[2,512], index: 3, kind: input, shape index: {}]   ;;  %s2456_s4 = inlined_call_operand.vmem [shape: f32[64,256], index: 4, kind: input, shape index: {}]   ;;  %s2457_s5 = inlined_call_operand.vmem [shape: f32[32,64], index: 5, kind: input, shape index: {}]   ;;  %s2458_s6 = inlined_call_operand.vmem [shape: f32[32,128], index: 6, kind: input, shape index: {}]   ;;  %s2459_s7 = inlined_call_operand.hbm [shape: f32[2,512], index: 7, kind: output, shape index: {}]  }
   0x1   :  { %v168_v0 = vld [vmem:[%s2453_s1 + $0xf8] sm:$0xff]  ;;  %v167_v2 = vld [vmem:[%s2453_s1 + $0xf0] sm:$0xff]  ;;  %1675 = vset.pattern.permute.xlu1 %v1741_v4  ;;  %v166_v5 = vld [vmem:[%s2453_s1 + $0xe8] sm:$0xff]  ;;  %1674 = vset.pattern.permute.xlu0 %v1741_v4 }
   0x2   :  { %v152_v1 = vld [vmem:[%s2453_s1 + $0x78] sm:$0xff]  ;;  %1591 = vmatprep.subr.mxu0 %v168_v0  ;;  %v151_v3 = vld [vmem:[%s2453_s1 + $0x70] sm:$0xff]  ;;  %v150_v6 = vld [vmem:[%s2453_s1 + $0x68] sm:$0xff] }
   0x3   :  { %1592 = vmatpush3.msra.mxu0 %v152_v1  ;;  %v165_v7 = vld [vmem:[%s2453_s1 + $0xe0] sm:$0xff]  ;;  %v164_v9 = vld [vmem:[%s2453_s1 + $0xd8] sm:$0xff]  ;;  %v163_v11 = vld [vmem:[%s2453_s1 + $0xd0] sm:$0xff] }
   0x4   :  { %1593 = vmatprep.subr.mxu0 %v167_v2  ;;  %v149_v8 = vld [vmem:[%s2453_s1 + $0x60] sm:$0xff]  ;;  %v148_v10 = vld [vmem:[%s2453_s1 + $0x58] sm:$0xff]  ;;  %v147_v12 = vld [vmem:[%s2453_s1 + $0x50] sm:$0xff] }
   0x5   :  { %1594 = vmatpush3.msra.mxu0 %v151_v3  ;;  %v162_v13 = vld [vmem:[%s2453_s1 + $0xc8] sm:$0xff]  ;;  %v161_v16 = vld [vmem:[%s2453_s1 + $0xc0] sm:$0xff]  ;;  %v160_v18 = vld [vmem:[%s2453_s1 + $0xb8] sm:$0xff] }
   0x6   :  { %1595 = vmatprep.subr.mxu0 %v166_v5  ;;  %v122_v14 = vld [vmem:[%s2456_s4 + $0x8] sm:$0xff]  ;;  %v145_v17 = vld [vmem:[%s2453_s1 + $0x40] sm:$0xff]  ;;  %v144_v19 = vld [vmem:[%s2453_s1 + $0x38] sm:$0xff] }
   0x7   :  { %1596 = vmatpush3.msra.mxu0 %v150_v6  ;;  %v146_v15 = vld [vmem:[%s2453_s1 + $0x48] sm:$0xff]  ;;  %233 = vmatprep.mubr.f32.mxu0 %v122_v14  ;;  %v159_v20 = vld [vmem:[%s2453_s1 + $0xb0] sm:$0xff]  ;;  %v1862_v22 = vld [vmem:[%s2458_s6 + $0x18] sm:$0xff] }
   0x8   :  { %1597 = vmatprep.subr.mxu0 %v165_v7  ;;  %v1857_v21 = vld [vmem:[%s2458_s6 + $0x8] sm:$0xff]  ;;  %v143_v23 = vld [vmem:[%s2453_s1 + $0x30] sm:$0xff] }
   0x9   :  { %1598 = vmatpush3.msra.mxu0 %v149_v8  ;;  %281 = vperm.xlu1 %1675, %v1857_v21  }
   0xa   :  { %1599 = vmatprep.subr.mxu0 %v164_v9 }
   0xb   :  { %1600 = vmatpush3.msra.mxu0 %v148_v10 }
   0xc   :  { %1601 = vmatprep.subr.mxu0 %v163_v11 }
   0xd   :  { %1602 = vmatpush3.msra.mxu0 %v147_v12 }
   0xe   :  { %1603 = vmatprep.subr.mxu0 %v162_v13 }
   0xf   :  { %1604 = vmatpush3.msra.mxu0 %v146_v15 }
  0x10   :  { %1605 = vmatprep.subr.mxu0 %v161_v16 }
  0x11   :  { %1606 = vmatpush3.msra.mxu0 %v145_v17 }
  0x12   :  { %1607 = vmatprep.subr.mxu0 %v160_v18 }
  0x13   :  { %12 = vsyncpa [#allocation3], 0  ;;  %1608 = vmatpush3.msra.mxu0 %v144_v19  ;;  %v158_v24 = vld [vmem:[%s2453_s1 + $0xa8] sm:$0xff]  ;;  %v1874_v25 = vld [vmem:[%s2458_s6] sm:$0xff]  ;;  %291 = vperm.xlu0 %1674, %v1862_v22   ;;  %s1742_s25 = smov 126   ;;  %v1743_v54 = vmov 0  }
  0x14   :  { %1609 = vmatprep.subr.mxu0 %v159_v20  ;;  %v142_v26 = vld [vmem:[%s2453_s1 + $0x28] sm:$0xff]  ;;  %v29_v27 = vld [vmem:[%s2458_s6 + $0x10] sm:$0xff]  ;;  %v157_v28 = vld [vmem:[%s2453_s1 + $0xa0] sm:$0xff]  ;;  %276 = vperm.xlu1 %1675, %v1874_v25   ;;  %v1744_v55 = vmov 0.0   ;;  %vm1745_vm0 = vmmov 0   ;;  %vm310_vm1 = vcmask 261120  }
  0x15   :  { %1610 = vmatpush3.msra.mxu0 %v143_v23  ;;  %v141_v29 = vld [vmem:[%s2453_s1 + $0x20] sm:$0xff]  ;;  %v156_v30 = vld [vmem:[%s2453_s1 + $0x98] sm:$0xff]  ;;  %v155_v33 = vld [vmem:[%s2453_s1 + $0x90] sm:$0xff]  ;;  %1652 = vmatprep.subr.mxu1 %v1744_v55  ;;  %vm425_vm2 = vcmask 523264   ;;  %vm57_vm4 = vcmask 1041408   ;;  %vm897_vm5 = vcmask 1040384  }
  0x16   :  { %1611 = vmatprep.subr.mxu0 %v158_v24  ;;  %v140_v31 = vld [vmem:[%s2453_s1 + $0x18] sm:$0xff]  ;;  %v32_v32 = vld [vmem:[%s2458_s6 + $0x1] sm:$0x1]  ;;  %v139_v34 = vld [vmem:[%s2453_s1 + $0x10] sm:$0xff]  ;;  %1660 = vmatprep.mubr.msk.f32.mxu1 %vm1745_vm0, %v1744_v55  ;;  %vm1347_vm6 = vcmask 1041409  }
  0x17   :  { %1612 = vmatpush3.msra.mxu0 %v142_v26  ;;  %286 = vperm.xlu0 %1674, %v29_v27   ;;  %v154_v35 = vld [vmem:[%s2453_s1 + $0x88] sm:$0xff]  ;;  %v153_v37 = vld [vmem:[%s2453_s1 + $0x80] sm:$0xff]  ;;  %v124_v40 = vld [vmem:[%s2456_s4 + $0x18] sm:$0xff] }
  0x18   :  { %1613 = vmatprep.subr.mxu0 %v157_v28  ;;  %v138_v36 = vld [vmem:[%s2453_s1 + $0x8] sm:$0xff]  ;;  %v137_v38 = vld [vmem:[%s2453_s1] sm:$0xff]  ;;  %v123_v41 = vld [vmem:[%s2456_s4 + $0x10] sm:$0xff]  ;;  %1676 = vset.pattern.permute.xlu1 %v1743_v54 }
  0x19   :  { %1614 = vmatpush3.msra.mxu0 %v141_v29  ;;  %v121_v39 = vld [vmem:[%s2456_s4] sm:$0xff]  ;;  %v126_v42 = vld [vmem:[%s2456_s4 + $0x28] sm:$0xff]  ;;  %v128_v44 = vld [vmem:[%s2456_s4 + $0x38] sm:$0xff]  ;;  %666 = vperm.xlu1 %1676, %v1862_v22  }
  0x1a   :  { %1615 = vmatprep.subr.mxu0 %v156_v30  ;;  %v125_v43 = vld [vmem:[%s2456_s4 + $0x20] sm:$0xff]  ;;  %v127_v45 = vld [vmem:[%s2456_s4 + $0x30] sm:$0xff]  ;;  %v130_v46 = vld [vmem:[%s2456_s4 + $0x48] sm:$0xff] }
  0x1b   :  { %1616 = vmatpush3.msra.mxu0 %v140_v31  ;;  %308 = vrot.lane.b32.xlu0 %v32_v32, %s1742_s25  ;;  %v129_v47 = vld [vmem:[%s2456_s4 + $0x40] sm:$0xff]  ;;  %v132_v48 = vld [vmem:[%s2456_s4 + $0x58] sm:$0xff]  ;;  %v131_v49 = vld [vmem:[%s2456_s4 + $0x50] sm:$0xff] }
  0x1c   :  { %1617 = vmatprep.subr.mxu0 %v155_v33  ;;  %v134_v50 = vld [vmem:[%s2456_s4 + $0x68] sm:$0xff]  ;;  %v133_v51 = vld [vmem:[%s2456_s4 + $0x60] sm:$0xff]  ;;  %v136_v52 = vld [vmem:[%s2456_s4 + $0x78] sm:$0xff]  ;;  %1677 = vset.pattern.permute.xlu0 %v1743_v54 }
  0x1d   :  { %1618 = vmatpush3.msra.mxu0 %v139_v34  ;;  %v135_v53 = vld [vmem:[%s2456_s4 + $0x70] sm:$0xff]  ;;  %v31_v19 = vld [vmem:[%s2458_s6] sm:$0x1]  ;;  %v422_v31 = vld [vmem:[%s2454_s2 + $0xe8] sm:$0xff] }
  0x1e   :  { %1619 = vmatprep.subr.mxu0 %v154_v35  ;;  %v421_v32 = vld [vmem:[%s2454_s2 + $0xe0] sm:$0xff]  ;;  %v418_v33 = vld [vmem:[%s2454_s2 + $0xc8] sm:$0xff] }
  0x1f   :  { %1620 = vmatpush3.msra.mxu0 %v138_v36  ;;  %662 = vperm.xlu0 %1677, %v29_v27   ;;  %v417_v34 = vld [vmem:[%s2454_s2 + $0xc0] sm:$0xff]  ;;  %v414_v35 = vld [vmem:[%s2454_s2 + $0xa8] sm:$0xff] }
  0x20   :  { %1621 = vmatprep.subr.mxu0 %v153_v37  ;;  %v413_v36 = vld [vmem:[%s2454_s2 + $0xa0] sm:$0xff]  ;;  %v410_v37 = vld [vmem:[%s2454_s2 + $0x88] sm:$0xff] }
  0x21   :  { %1622 = vmatpush3.msra.mxu0 %v137_v38  ;;  %v409_v38 = vld [vmem:[%s2454_s2 + $0x80] sm:$0xff] }
  0x22   :  { %234 = vmatmul.mubr.f32.vlgmr.msra.gmra.mxu0 %v121_v39  ;;  %v406_v39 = vld [vmem:[%s2454_s2 + $0x68] sm:$0xff] }
  0x23   :  { %238 = vmatprep.mubr.f32.mxu0 %v124_v40  ;;  %658 = vperm.xlu0 %1677, %v1857_v21   ;;  %v405_v40 = vld [vmem:[%s2454_s2 + $0x60] sm:$0xff] }
  0x26   :  { %239 = vmatmul.mubr.f32.gmra.mxu0 %v123_v41  ;;  %v402_v41 = vld [vmem:[%s2454_s2 + $0x48] sm:$0xff] }
  0x27   :  { %243 = vmatprep.mubr.f32.mxu0 %v126_v42  ;;  %v401_v42 = vld [vmem:[%s2454_s2 + $0x40] sm:$0xff] }
  0x2a   :  { %244 = vmatmul.mubr.f32.gmra.mxu0 %v125_v43  ;;  %v398_v43 = vld [vmem:[%s2454_s2 + $0x28] sm:$0xff] }
  0x2b   :  { %248 = vmatprep.mubr.f32.mxu0 %v128_v44  ;;  %v397_v44 = vld [vmem:[%s2454_s2 + $0x20] sm:$0xff] }
  0x2e   :  { %249 = vmatmul.mubr.f32.gmra.mxu0 %v127_v45  ;;  %v394_v45 = vld [vmem:[%s2454_s2 + $0x8] sm:$0xff] }
  0x2f   :  { %253 = vmatprep.mubr.f32.mxu0 %v130_v46  ;;  %v393_v46 = vld [vmem:[%s2454_s2] sm:$0xff] }
  0x32   :  { %254 = vmatmul.mubr.f32.gmra.mxu0 %v129_v47  ;;  %v389_v47 = vld [vmem:[%s2457_s5] sm:$0xff] }
  0x33   :  { %258 = vmatprep.mubr.f32.mxu0 %v132_v48  ;;  %v424_v48 = vld [vmem:[%s2454_s2 + $0xf8] sm:$0xff] }
  0x36   :  { %259 = vmatmul.mubr.f32.gmra.mxu0 %v131_v49  ;;  %v423_v49 = vld [vmem:[%s2454_s2 + $0xf0] sm:$0xff] }
  0x37   :  { %263 = vmatprep.mubr.f32.mxu0 %v134_v50  ;;  %v420_v50 = vld [vmem:[%s2454_s2 + $0xd8] sm:$0xff] }
  0x3a   :  { %264 = vmatmul.mubr.f32.gmra.mxu0 %v133_v51  ;;  %v419_v51 = vld [vmem:[%s2454_s2 + $0xd0] sm:$0xff] }
  0x3b   :  { %268 = vmatprep.mubr.f32.mxu0 %v136_v52  ;;  %v390_v52 = vld [vmem:[%s2457_s5 + $0x8] sm:$0xff] }
  0x3e   :  { %269 = vmatmul.mubr.f32.gmra.mxu0 %v135_v53  ;;  %v416_v53 = vld [vmem:[%s2454_s2 + $0xb8] sm:$0xff] }
  0x3f   :  { %845 = vmatprep.mubr.f32.mxu0 %v1744_v55 }
  0x84   :  { %v282_v12 = vpop.permute.xlu1 %281 }
  0x8e   :  { %v292_v10 = vpop.permute.xlu0 %291 }
  0x8f   :  { %v277_v23 = vpop.permute.xlu1 %276 }
  0x92   :  { %v287_v15 = vpop.permute.xlu0 %286 }
  0x96   :  { %v309_v30 = vpop.permute.xlu0 %308 }
  0xe2   :  { %v1623_v56 = vpop.f32.mrf.mxu0 }
  0xe4   :  { %v1624_v57 = vpop.f32.mrf.mxu0 }
  0xe5   :  { %v1625_v58 = vadd.f32 %v1624_v57, %v1623_v56  ;;  %v415_v56 = vld [vmem:[%s2454_s2 + $0xb0] sm:$0xff]  ;;  %v412_v57 = vld [vmem:[%s2454_s2 + $0x98] sm:$0xff] }
  0xe6   :  { %v1626_v59 = vpop.f32.mrf.mxu0 }
  0xe7   :  { %619 = vperm.xlu1 %1676, %v1625_v58  }
  0xe8   :  { %v1627_v60 = vpop.f32.mrf.mxu0 }
  0xe9   :  { %v1628_v61 = vadd.f32 %v1627_v60, %v1626_v59  ;;  %v391_v59 = vld [vmem:[%s2457_s5 + $0x10] sm:$0xff]  ;;  %v408_v60 = vld [vmem:[%s2454_s2 + $0x78] sm:$0xff] }
  0xea   :  { %v1629_v62 = vpop.f32.mrf.mxu0 }
  0xeb   :  { %624 = vperm.xlu1 %1676, %v1628_v61  }
  0xec   :  { %v1630_v63 = vpop.f32.mrf.mxu0 }
  0xed   :  { %v1631_v0 = vadd.f32 %v1630_v63, %v1629_v62  ;;  %v404_v62 = vld [vmem:[%s2454_s2 + $0x58] sm:$0xff]  ;;  %v403_v63 = vld [vmem:[%s2454_s2 + $0x50] sm:$0xff] }
  0xee   :  { %v1632_v1 = vpop.f32.mrf.mxu0 }
  0xef   :  { %629 = vperm.xlu0 %1677, %v1631_v0  }
  0xf0   :  { %v1633_v2 = vpop.f32.mrf.mxu0 }
  0xf1   :  { %v1634_v3 = vadd.f32 %v1633_v2, %v1632_v1  ;;  %v400_v1 = vld [vmem:[%s2454_s2 + $0x38] sm:$0xff]  ;;  %v399_v2 = vld [vmem:[%s2454_s2 + $0x30] sm:$0xff] }
  0xf2   :  { %v1635_v5 = vpop.f32.mrf.mxu0 }
  0xf3   :  { %1678 = vset.pattern.permute.xlu0 %v1741_v4  ;;  %634 = vperm.xlu1 %1676, %v1634_v3  }
  0xf4   :  { %v1636_v6 = vpop.f32.mrf.mxu0  ;;  %1109 = vperm.xlu0 %1678, %v1634_v3   ;;  %v396_v3 = vld [vmem:[%s2454_s2 + $0x18] sm:$0xff] }
  0xf5   :  { %v1637_v20 = vadd.f32 %v1636_v6, %v1635_v5  ;;  %v395_v5 = vld [vmem:[%s2454_s2 + $0x10] sm:$0xff]  ;;  %v2109_v6 = vld [vmem:[%s2458_s6 + $0x2] sm:$0x1] }
  0xf6   :  { %v1638_v7 = vpop.f32.mrf.mxu0 }
  0xf7   :  { %654 = vperm.xlu1 %1676, %v1874_v25   ;;  %v294_v26 = vadd.f32 %v1637_v20, %v277_v23 }
  0xf8   :  { %v1639_v8 = vpop.f32.mrf.mxu0  ;;  %1097 = vperm.xlu0 %1678, %v1625_v58   ;;  %v411_v58 = vld [vmem:[%s2454_s2 + $0x90] sm:$0xff] }
  0xf9   :  { %v1640_v17 = vadd.f32 %v1639_v8, %v1638_v7  ;;  %v298_v29 = vmax.f32 %v294_v26, 0.0  ;;  %v1746_v7 = vmov 2  }
  0xfa   :  { %v1641_v9 = vpop.f32.mrf.mxu0 }
  0xfb   :  { %1679 = vset.pattern.permute.xlu1 %v1741_v4  ;;  %v295_v24 = vadd.f32 %v1640_v17, %v282_v12 }
  0xfc   :  { %v1642_v11 = vpop.f32.mrf.mxu0  ;;  %1105 = vperm.xlu1 %1679, %v1631_v0   ;;  %v392_v0 = vld [vmem:[%s2457_s5 + $0x18] sm:$0xff]  ;;  %1680 = vset.pattern.permute.xlu0 %v1746_v7 }
  0xfd   :  { %v1643_v14 = vadd.f32 %v1642_v11, %v1641_v9  ;;  %v299_v28 = vmax.f32 %v295_v24, 0.0  ;;  %702 = vperm.xlu0 %1680, %v2109_v6  }
  0xfe   :  { %v1644_v13 = vpop.f32.mrf.mxu0 }
  0xff   :  { %v296_v21 = vadd.f32 %v1643_v14, %v287_v15 }
 0x100   :  { %v1645_v16 = vpop.f32.mrf.mxu0  ;;  %1101 = vperm.xlu1 %1679, %v1628_v61   ;;  %v407_v61 = vld [vmem:[%s2454_s2 + $0x70] sm:$0xff] }
 0x101   :  { %v1646_v18 = vadd.f32 %v1645_v16, %v1644_v13  ;;  %v300_v27 = vmax.f32 %v296_v21, 0.0  ;;  %1682 = vset.pattern.permute.xlu0 %v1743_v54  ;;  %v2121_v13 = vpop.permute.xlu0 %662 }
 0x103   :  { %v297_v22 = vadd.f32 %v1646_v18, %v292_v10  ;;  %v2115_v10 = vpop.permute.xlu1 %666 }
 0x104   :  { %706 = vrot.lane.b32.xlu1 %v31_v19, %s1742_s25 }
 0x105   :  { %v301_v25 = vmax.f32 %v297_v22, 0.0  ;;  %v2127_v19 = vpop.permute.xlu0 %658 }
 0x107   :  { %1653 = vmatpush3.msra.mxu1 %v301_v25 }
 0x108   :  { %1654 = vmatprep.subr.mxu1 %v1744_v55 }
 0x109   :  { %1655 = vmatpush3.msra.mxu1 %v300_v27 }
 0x10a   :  { %1656 = vmatprep.subr.mxu1 %v1744_v55 }
 0x10b   :  { %1657 = vmatpush3.msra.mxu1 %v299_v28 }
 0x10c   :  { %1658 = vmatprep.subr.mxu1 %v1744_v55 }
 0x10d   :  { %1659 = vmatpush3.msra.mxu1 %v298_v29 }
 0x10e   :  { %1661 = vmatmul.mubr.msk.f32.vlgmr.msra.gmra.mxu1 %vm310_vm1, %v309_v30  ;;  %454 = vmatprep.subr.mxu1 %v422_v31 }
 0x10f   :  { %455 = vmatpush1.msra.mxu1 %v421_v32  ;;  %502 = vmatprep.mubr.f32.mxu1 %v1744_v55 }
 0x110   :  { %456 = vmatprep.subr.mxu1 %v418_v33 }
 0x111   :  { %457 = vmatpush1.msra.mxu1 %v417_v34 }
 0x112   :  { %458 = vmatprep.subr.mxu1 %v414_v35 }
 0x113   :  { %459 = vmatpush1.msra.mxu1 %v413_v36 }
 0x114   :  { %460 = vmatprep.subr.mxu1 %v410_v37 }
 0x115   :  { %461 = vmatpush1.msra.mxu1 %v409_v38 }
 0x116   :  { %462 = vmatprep.subr.mxu1 %v406_v39 }
 0x117   :  { %463 = vmatpush1.msra.mxu1 %v405_v40 }
 0x118   :  { %464 = vmatprep.subr.mxu1 %v402_v41 }
 0x119   :  { %465 = vmatpush1.msra.mxu1 %v401_v42 }
 0x11a   :  { %466 = vmatprep.subr.mxu1 %v398_v43 }
 0x11b   :  { %467 = vmatpush1.msra.mxu1 %v397_v44 }
 0x11c   :  { %468 = vmatprep.subr.mxu1 %v394_v45 }
 0x11d   :  { %469 = vmatpush1.msra.mxu1 %v393_v46 }
 0x11e   :  { %1579 = vmatmul.mubr.msk.f32.vlgmr.msra.gmra.mxu1 %vm425_vm2, %v389_v47  ;;  %543 = vmatprep.subr.mxu1 %v424_v48 }
 0x11f   :  { %544 = vmatpush1.msra.mxu1 %v423_v49  ;;  %508 = vmatprep.mubr.f32.mxu1 %v1744_v55 }
 0x120   :  { %545 = vmatprep.subr.mxu1 %v420_v50 }
 0x121   :  { %546 = vmatpush1.msra.mxu1 %v419_v51 }
 0x122   :  { %1580 = vmatmul.mubr.msk.f32.gmra.mxu1 %vm425_vm2, %v390_v52  ;;  %547 = vmatprep.subr.mxu1 %v416_v53 }
 0x123   :  { %548 = vmatpush1.msra.mxu1 %v415_v56  ;;  %514 = vmatprep.mubr.f32.mxu1 %v1744_v55 }
 0x124   :  { %549 = vmatprep.subr.mxu1 %v412_v57 }
 0x125   :  { %550 = vmatpush1.msra.mxu1 %v411_v58 }
 0x126   :  { %1581 = vmatmul.mubr.msk.f32.gmra.mxu1 %vm425_vm2, %v391_v59  ;;  %551 = vmatprep.subr.mxu1 %v408_v60 }
 0x127   :  { %552 = vmatpush1.msra.mxu1 %v407_v61  ;;  %520 = vmatprep.mubr.f32.mxu1 %v1744_v55 }
 0x128   :  { %553 = vmatprep.subr.mxu1 %v404_v62 }
 0x129   :  { %554 = vmatpush1.msra.mxu1 %v403_v63 }
 0x12a   :  { %1582 = vmatmul.mubr.msk.f32.gmra.mxu1 %vm425_vm2, %v392_v0  ;;  %555 = vmatprep.subr.mxu1 %v400_v1 }
 0x12b   :  { %556 = vmatpush1.msra.mxu1 %v399_v2  ;;  %591 = vmatprep.mubr.f32.mxu1 %v1744_v55 }
 0x12c   :  { %557 = vmatprep.subr.mxu1 %v396_v3 }
 0x12d   :  { %558 = vmatpush1.msra.mxu1 %v395_v5 }
 0x12e   :  { %1583 = vmatmul.mubr.msk.f32.vlgmr.msra.gmra.mxu1 %vm425_vm2, %v389_v47 }
 0x12f   :  { %597 = vmatprep.mubr.f32.mxu1 %v1744_v55 }
 0x132   :  { %1584 = vmatmul.mubr.msk.f32.gmra.mxu1 %vm425_vm2, %v390_v52 }
 0x133   :  { %603 = vmatprep.mubr.f32.mxu1 %v1744_v55 }
 0x136   :  { %1585 = vmatmul.mubr.msk.f32.gmra.mxu1 %vm425_vm2, %v391_v59 }
 0x137   :  { %609 = vmatprep.mubr.f32.mxu1 %v1744_v55 }
 0x13a   :  { %1586 = vmatmul.mubr.msk.f32.gmra.mxu1 %vm425_vm2, %v392_v0 }
 0x13b   :  { %774 = vmatprep.mubr.f32.mxu1 %v1744_v55 }
 0x162   :  { %v2117_v11 = vpop.permute.xlu1 %619 }
 0x166   :  { %v2123_v14 = vpop.permute.xlu1 %624 }
 0x16a   :  { %v2131_v24 = vpop.permute.xlu0 %629 }
 0x16e   :  { %v2125_v17 = vpop.permute.xlu1 %634 }
 0x16f   :  { %v2149_v39 = vpop.permute.xlu0 %1109 }
 0x172   :  { %v2129_v22 = vpop.permute.xlu1 %654 }
 0x173   :  { %v2172_v63 = vpop.permute.xlu0 %1097 }
 0x177   :  { %v2140_v32 = vpop.permute.xlu1 %1105 }
 0x17b   :  { %v2164_v53 = vpop.permute.xlu1 %1101 }
 0x1ce   :  { %v2113_v8 = vpop.f32.mrf.mxu1 }
 0x1d0   :  { %v1662_v9 = vpop.f32.mrf.mxu1 }
 0x1de   :  { %v2119_v12 = vpop.f32.mrf.mxu1 }
 0x1df   :  { %v637_v40 = vadd.f32 %v2117_v11, %v2119_v12 }
 0x1e0   :  { %v506_v15 = vpop.f32.mrf.mxu1 }
 0x1e1   :  { %v638_v36 = vadd.f32 %v2117_v11, %v506_v15  ;;  %v669_v56 = vadd.f32 %v2129_v22, %v637_v40  ;;  %v1113_v3 = vadd.f32 %v2172_v63, %v506_v15 }
 0x1e2   :  { %v510_v16 = vpop.f32.mrf.mxu1 }
 0x1e3   :  { %v641_v33 = vadd.f32 %v2123_v14, %v510_v16  ;;  %v670_v49 = vadd.f32 %v2129_v22, %v638_v36  ;;  %v1116_v1 = vadd.f32 %v2164_v53, %v510_v16 }
 0x1e4   :  { %v512_v18 = vpop.f32.mrf.mxu1 }
 0x1e5   :  { %v642_v30 = vadd.f32 %v2123_v14, %v512_v18  ;;  %v673_v46 = vadd.f32 %v2127_v19, %v641_v33  ;;  %v1117_v59 = vadd.f32 %v2164_v53, %v512_v18  ;;  %v686_v9 = vmax.f32 %v670_v49, 0.0 }
 0x1e6   :  { %v516_v20 = vpop.f32.mrf.mxu1  ;;  %v685_v18 = vmax.f32 %v669_v56, 0.0  ;;  %v1132_v15 = vadd.f32 %v1116_v1, %v2127_v19 }
 0x1e7   :  { %v645_v28 = vadd.f32 %v2131_v24, %v516_v20  ;;  %v674_v42 = vadd.f32 %v2127_v19, %v642_v30  ;;  %v1120_v58 = vadd.f32 %v2140_v32, %v516_v20  ;;  %v689_v0 = vmax.f32 %v673_v46, 0.0 }
 0x1e8   :  { %v518_v21 = vpop.f32.mrf.mxu1  ;;  %v1112_v20 = vadd.f32 %v2172_v63, %v2119_v12  ;;  %v1133_v16 = vadd.f32 %v1117_v59, %v2127_v19 }
 0x1e9   :  { %v646_v25 = vadd.f32 %v2131_v24, %v518_v21  ;;  %v677_v41 = vadd.f32 %v2121_v13, %v645_v28  ;;  %v1121_v50 = vadd.f32 %v2140_v32, %v518_v21  ;;  %v690_v62 = vmax.f32 %v674_v42, 0.0 }
 0x1ea   :  { %v522_v23 = vpop.f32.mrf.mxu1  ;;  %v1136_v21 = vadd.f32 %v1120_v58, %v2121_v13  ;;  %v1149_v42 = vmax.f32 %v1133_v16, 0.0 }
 0x1eb   :  { %v649_v26 = vadd.f32 %v2125_v17, %v522_v23  ;;  %v678_v37 = vadd.f32 %v2121_v13, %v646_v25  ;;  %v1124_v48 = vadd.f32 %v2149_v39, %v522_v23  ;;  %v693_v57 = vmax.f32 %v677_v41, 0.0  ;;  %v2181_v23 = vpop.permute.xlu1 %706 }
 0x1ec   :  { %v524_v27 = vpop.f32.mrf.mxu1  ;;  %v1137_v5 = vadd.f32 %v1121_v50, %v2121_v13  ;;  %v1152_v36 = vmax.f32 %v1136_v21, 0.0 }
 0x1ed   :  { %v650_v29 = vadd.f32 %v2125_v17, %v524_v27  ;;  %v681_v34 = vadd.f32 %v2115_v10, %v649_v26  ;;  %v1125_v43 = vadd.f32 %v2149_v39, %v524_v27  ;;  %v694_v52 = vmax.f32 %v678_v37, 0.0 }
 0x1ee   :  { %v2138_v31 = vpop.f32.mrf.mxu1  ;;  %v1140_v2 = vadd.f32 %v1124_v48, %v2115_v10 }
 0x1ef   :  { %v682_v35 = vadd.f32 %v2115_v10, %v650_v29  ;;  %v697_v47 = vmax.f32 %v681_v34, 0.0  ;;  %v1141_v60 = vadd.f32 %v1125_v43, %v2115_v10  ;;  %v1129_v29 = vadd.f32 %v1113_v3, %v2129_v22 }
 0x1f0   :  { %v2147_v38 = vpop.f32.mrf.mxu1  ;;  %v1156_v27 = vmax.f32 %v1140_v2, 0.0  ;;  %v1153_v34 = vmax.f32 %v1137_v5, 0.0  ;;  %v1148_v43 = vmax.f32 %v1132_v15, 0.0 }
 0x1f1   :  { %v698_v45 = vmax.f32 %v682_v35, 0.0  ;;  %v1157_v26 = vmax.f32 %v1141_v60, 0.0  ;;  %v1128_v35 = vadd.f32 %v1112_v20, %v2129_v22 }
 0x1f2   :  { %v2156_v44 = vpop.f32.mrf.mxu1 }
 0x1f3   :  { %734 = vmatprep.subr.mxu1 %v698_v45  ;;  %v640_v45 = vadd.f32 %v2117_v11, %v2147_v38  ;;  %v1144_v49 = vmax.f32 %v1128_v35, 0.0 }
 0x1f4   :  { %v2162_v51 = vpop.f32.mrf.mxu1  ;;  %735 = vmatpush1.msra.mxu1 %v697_v47 }
 0x1f5   :  { %736 = vmatprep.subr.mxu1 %v694_v52  ;;  %v644_v37 = vadd.f32 %v2123_v14, %v2162_v51  ;;  %v672_v60 = vadd.f32 %v2129_v22, %v640_v45 }
 0x1f6   :  { %v2170_v61 = vpop.f32.mrf.mxu1  ;;  %737 = vmatpush1.msra.mxu1 %v693_v57 }
 0x1f7   :  { %738 = vmatprep.subr.mxu1 %v690_v62  ;;  %v647_v12 = vadd.f32 %v2131_v24, %v2170_v61  ;;  %v676_v50 = vadd.f32 %v2127_v19, %v644_v37  ;;  %v1122_v2 = vadd.f32 %v2140_v32, %v2170_v61  ;;  %v688_v20 = vmax.f32 %v672_v60, 0.0 }
 0x1f8   :  { %v607_v7 = vpop.f32.mrf.mxu1  ;;  %739 = vmatpush1.msra.mxu1 %v689_v0 }
 0x1f9   :  { %740 = vmatprep.subr.mxu1 %v686_v9  ;;  %v648_v28 = vadd.f32 %v2131_v24, %v607_v7  ;;  %v643_v24 = vadd.f32 %v2123_v14, %v2156_v44  ;;  %v679_v48 = vadd.f32 %v2121_v13, %v647_v12  ;;  %v1145_v14 = vmax.f32 %v1129_v29, 0.0 }
 0x1fa   :  { %v611_v25 = vpop.f32.mrf.mxu1  ;;  %741 = vmatpush1.msra.mxu1 %v685_v18  ;;  %v692_v5 = vmax.f32 %v676_v50, 0.0  ;;  %v1118_v9 = vadd.f32 %v2164_v53, %v2156_v44  ;;  %v1138_v16 = vadd.f32 %v1122_v2, %v2121_v13  ;;  %v1747_v29 = vmov 1983009808  }
 0x1fb   :  { %v651_v30 = vadd.f32 %v2125_v17, %v611_v25  ;;  %1184 = vmatprep.subr.mxu1 %v1157_v26  ;;  %1587 = vmatmul.mubr.msk.f32.vlgmr.msra.gmra.mxu1 %vm310_vm1, %v2181_v23  ;;  %v680_v46 = vadd.f32 %v2121_v13, %v648_v28  ;;  %v675_v57 = vadd.f32 %v2127_v19, %v643_v24  ;;  %v695_v1 = vmax.f32 %v679_v48, 0.0 }
 0x1fc   :  { %v613_v33 = vpop.f32.mrf.mxu1  ;;  %1185 = vmatpush1.msra.mxu1 %v1156_v27  ;;  %1224 = vmatprep.mubr.f32.mxu1 %v1744_v55  ;;  %v1126_v59 = vadd.f32 %v2149_v39, %v611_v25  ;;  %v40_v12 = vlaneseq }
 0x1fd   :  { %v652_v40 = vadd.f32 %v2125_v17, %v613_v33  ;;  %v683_v41 = vadd.f32 %v2115_v10, %v651_v30  ;;  %1186 = vmatprep.subr.mxu1 %v1153_v34  ;;  %v639_v17 = vadd.f32 %v2117_v11, %v2138_v31  ;;  %v1127_v52 = vadd.f32 %v2149_v39, %v613_v33  ;;  %v703_v30 = vpop.permute.xlu0 %702 }
 0x1fe   :  { %1187 = vmatpush1.msra.mxu1 %v1152_v36  ;;  %v1123_v11 = vadd.f32 %v2140_v32, %v607_v7  ;;  %v696_v62 = vmax.f32 %v680_v46, 0.0  ;;  %v1119_v39 = vadd.f32 %v2164_v53, %v2162_v51  ;;  %v691_v7 = vmax.f32 %v675_v57, 0.0 }
 0x1ff   :  { %v684_v47 = vadd.f32 %v2115_v10, %v652_v40  ;;  %1188 = vmatprep.subr.mxu1 %v1149_v42  ;;  %v699_v58 = vmax.f32 %v683_v41, 0.0  ;;  %v671_v0 = vadd.f32 %v2129_v22, %v639_v17  ;;  %v1143_v3 = vadd.f32 %v1127_v52, %v2115_v10  ;;  %v2258_v17 = vld [vmem:[%s2455_s3] sm:$0xff]  ;;  %s1751_s3 = smov [#allocation2]  }
 0x200   :  { %1189 = vmatpush1.msra.mxu1 %v1148_v43  ;;  %v1142_v18 = vadd.f32 %v1126_v59, %v2115_v10  ;;  %v1115_v32 = vadd.f32 %v2172_v63, %v2147_v38  ;;  %v1139_v61 = vadd.f32 %v1123_v11, %v2121_v13  ;;  %v1114_v51 = vadd.f32 %v2172_v63, %v2138_v31  ;;  %s1569_s16 = sshll.u32 %s1751_s3, 4  ;;  %s1570_s16 = int_to_ptr.vmem [resolvable:$true] %s1569_s16 }
 0x201   :  { %v700_v56 = vmax.f32 %v684_v47, 0.0  ;;  %1190 = vmatprep.subr.mxu1 %v1145_v14  ;;  %v687_v21 = vmax.f32 %v671_v0, 0.0  ;;  %v1135_v25 = vadd.f32 %v1119_v39, %v2127_v19  ;;  %v1159_v44 = vmax.f32 %v1143_v3, 0.0  ;;  %s1719_s1 = scalar_lea.vmem %s1570_s16, 128  ;;  %p1724_p1 = scmp.lt.s32.totalorder %s1570_s16, %s1570_s16 }
 0x202   :  { %1191 = vmatpush1.msra.mxu1 %v1144_v49  ;;  %v1134_v10 = vadd.f32 %v1118_v9, %v2127_v19  ;;  %v1158_v53 = vmax.f32 %v1142_v18, 0.0  ;;  %v1131_v38 = vadd.f32 %v1115_v32, %v2129_v22  ;;  %v1155_v26 = vmax.f32 %v1139_v61, 0.0  ;;  %p1720_p0 = scmp.ne.s32.totalorder %s1570_s16, %s1719_s1  ;;  %p1725_p2 = scmp.lt.s32.totalorder %s1719_s1, %s1719_s1 }
 0x203   :  { %805 = vmatprep.subr.mxu0 %v700_v56  ;;  %1589 = vmatmul.mubr.msk.f32.vlgmr.msra.gmra.mxu1 %vm310_vm1, %v2181_v23  ;;  %v1130_v31 = vadd.f32 %v1114_v51, %v2129_v22  ;;  %v1154_v63 = vmax.f32 %v1138_v16, 0.0  ;;  %v1151_v13 = vmax.f32 %v1135_v25, 0.0  ;;  %v38_v22 = vunpack.c.l.s4 %v1747_v29 }
 0x204   :  { %806 = vmatpush1.msra.mxu0 %v699_v58  ;;  %v1150_v15 = vmax.f32 %v1134_v10, 0.0  ;;  %v1147_v19 = vmax.f32 %v1131_v38, 0.0  ;;  %v2245_v34 = vshrl.u32 %v40_v12, 7  ;;  %vm852_vm3 = vcmp.gt.f32.partialorder %v2258_v17, 0.0  ;;  %p1726_p3 = por %p1725_p2, %p1724_p1 }
 0x205   :  { %807 = vmatprep.subr.mxu0 %v696_v62  ;;  %v1146_v27 = vmax.f32 %v1130_v31, 0.0  ;;  %v39_v33 = vunpack.c.0.s8 %v38_v22  ;;  %vm2441_vm11 = vcmp.lt.s32.totalorder %v40_v12, 512 }
 0x206   :  { %808 = vmatpush1.msra.mxu0 %v695_v1  ;;  %v2264_v11 = vsub.s32 0, %v2245_v34  ;;  %v2267_v62 = vsub.s32 2, %v2245_v34  ;;  %v2270_v0 = vsub.s32 4, %v2245_v34  ;;  %v2273_v1 = vsub.s32 6, %v2245_v34  ;;  %p1727_p4 = pnand %p1726_p3, %p1720_p0 }
 0x207   :  { %809 = vmatprep.subr.mxu0 %v692_v5  ;;  %v2250_v24 = vsub.s32 %v39_v33, %v2245_v34  ;;  %v2292_v22 = vsub.s32 1, %v2245_v34  ;;  %v2298_v33 = vsub.s32 5, %v2245_v34 }
 0x208   :  { %810 = vmatpush1.msra.mxu0 %v691_v7 }
 0x209   :  { %811 = vmatprep.subr.mxu0 %v688_v20 }
 0x20a   :  { %812 = vmatpush1.msra.mxu0 %v687_v21 }
 0x20b   :  { %1588 = vmatmul.mubr.msk.f32.vlgmr.msra.gmra.mxu0 %vm310_vm1, %v2181_v23  ;;  %1255 = vmatprep.subr.mxu0 %v1159_v44 }
 0x20c   :  { %1256 = vmatpush1.msra.mxu0 %v1158_v53  ;;  %1295 = vmatprep.mubr.f32.mxu0 %v1744_v55  ;;  %v2242_v55 = vld [vmem:[%s2452_s0] sm:$0xff] }
 0x20d   :  { %1257 = vmatprep.subr.mxu0 %v1155_v26  ;;  %v43_v46 = vrot.slane %v2242_v55, %v2250_v24 }
 0x20e   :  { %1258 = vmatpush1.msra.mxu0 %v1154_v63 }
 0x20f   :  { %1259 = vmatprep.subr.mxu0 %v1151_v13  ;;  %v51_v52 = vcombine.high %v43_v46, %v43_v46  ;;  %v58_v3 = vsel %vm57_vm4, %v43_v46, -inf }
 0x210   :  { %1260 = vmatpush1.msra.mxu0 %v1150_v15 }
 0x211   :  { %1261 = vmatprep.subr.mxu0 %v1147_v19  ;;  %v59_v5 = vsel %vm57_vm4, %v51_v52, -inf  ;;  %v1748_v52 = vmov 3  }
 0x212   :  { %1262 = vmatpush1.msra.mxu0 %v1146_v27  ;;  %v62_v10 = vmax.f32 %v58_v3, %v59_v5  ;;  %1681 = vset.pattern.permute.xlu1 %v1748_v52 }
 0x213   :  { %1590 = vmatmul.mubr.msk.f32.vlgmr.msra.gmra.mxu0 %vm310_vm1, %v2181_v23  ;;  %v36_v23 = vcombine.high %v2242_v55, %v2242_v55 }
 0x215   :  { %v50_v47 = vrot.slane %v36_v23, %v2250_v24 }
 0x217   :  { %v52_v56 = vcombine.high %v50_v47, %v50_v47  ;;  %v60_v7 = vsel %vm57_vm4, %v50_v47, -inf }
 0x219   :  { %v61_v9 = vsel %vm57_vm4, %v52_v56, -inf  ;;  %v1749_v56 = vmov 269488144  }
 0x21a   :  { %v63_v53 = vmax.f32 %v60_v7, %v61_v9 }
 0x2bb   :  { %v776_v28 = vpop.f32.mrf.mxu1 }
 0x2bc   :  { %v777_v36 = vadd.f32 %v776_v28, %v703_v30 }
 0x2bd   :  { %v778_v35 = vpop.f32.mrf.mxu1 }
 0x2be   :  { %v779_v37 = vadd.f32 %v778_v35, %v703_v30  ;;  %v2301_v35 = vsub.s32 7, %v2245_v34 }
 0x2c0   :  { %v857_v42 = vcombine.low %v777_v36, %v779_v37  ;;  %v64_v37 = vmax.f32 %v62_v10, %v63_v53 }
 0x2c2   :  { %v865_v49 = vrot.slane %v857_v42, %v2250_v24 }
 0x2c3   :  { %v1226_v41 = vpop.f32.mrf.mxu1 }
 0x2c4   :  { %v1227_v58 = vadd.f32 %v1226_v41, %v703_v30 }
 0x2c5   :  { %v1228_v14 = vpop.f32.mrf.mxu1 }
 0x2c6   :  { %v1229_v59 = vadd.f32 %v1228_v14, %v703_v30 }
 0x2c8   :  { %v1306_v61 = vcombine.low %v1227_v58, %v1229_v59 }
 0x2ca   :  { %v1314_v13 = vrot.slane %v1306_v61, %v2250_v24 }
 0x2cb   :  { %v847_v40 = vpop.f32.mrf.mxu0 }
 0x2cc   :  { %v848_v43 = vadd.f32 %v847_v40, %v703_v30 }
 0x2cd   :  { %v849_v45 = vpop.f32.mrf.mxu0 }
 0x2ce   :  { %v850_v48 = vadd.f32 %v849_v45, %v703_v30 }
 0x2d0   :  { %v858_v50 = vcombine.low %v848_v43, %v850_v48 }
 0x2d2   :  { %v872_v57 = vrot.slane %v858_v50, %v2250_v24 }
 0x2d3   :  { %v1297_v60 = vpop.f32.mrf.mxu0 }
 0x2d4   :  { %v873_v2 = vcombine.low %v865_v49, %v872_v57  ;;  %v1298_v32 = vadd.f32 %v1297_v60, %v703_v30  ;;  %v69_v57 = vunpack.c.l.s4 %v1749_v56 }
 0x2d5   :  { %v1299_v39 = vpop.f32.mrf.mxu0 }
 0x2d6   :  { %v875_v18 = vsel %vm852_vm3, %v873_v2, -1e+30  ;;  %v1300_v20 = vadd.f32 %v1299_v39, %v703_v30  ;;  %v2295_v30 = vsub.s32 3, %v2245_v34  ;;  %v70_v58 = vunpack.c.0.s8 %v69_v57 }
 0x2d7   :  { %v880_v21 = vrot.slane %v875_v18, %v2264_v11  ;;  %v884_v51 = vrot.slane %v875_v18, %v2267_v62  ;;  %v888_v16 = vrot.slane %v875_v18, %v2270_v0  ;;  %v892_v25 = vrot.slane %v875_v18, %v2273_v1 }
 0x2d8   :  { %v1307_v44 = vcombine.low %v1298_v32, %v1300_v20  ;;  %v2314_v59 = vsub.s32 %v70_v58, %v2245_v34 }
 0x2d9   :  { %v898_v38 = vsel %vm897_vm5, %v880_v21, -inf  ;;  %v899_v26 = vsel %vm897_vm5, %v884_v51, -inf  ;;  %v900_v31 = vsel %vm897_vm5, %v888_v16, -inf  ;;  %v901_v63 = vsel %vm897_vm5, %v892_v25, -inf }
 0x2da   :  { %v1321_v15 = vrot.slane %v1307_v44, %v2250_v24  ;;  %v902_v19 = vmax.f32 %v898_v38, %v899_v26  ;;  %v903_v27 = vmax.f32 %v900_v31, %v901_v63 }
 0x2dc   :  { %v1322_v28 = vcombine.low %v1314_v13, %v1321_v15  ;;  %v904_v29 = vmax.f32 %v902_v19, %v903_v27 }
 0x2de   :  { %v1323_v36 = vrot.slane %v1322_v28, 7  ;;  %905 = vmax.xlane.f32.xlu1 %v904_v29 }
 0x2e0   :  { %v1325_v23 = vsel %vm852_vm3, %v1323_v36, -1e+30 }
 0x2e1   :  { %v1330_v40 = vrot.slane %v1325_v23, %v2292_v22  ;;  %v1334_v41 = vrot.slane %v1325_v23, %v2295_v30  ;;  %v1338_v42 = vrot.slane %v1325_v23, %v2298_v33  ;;  %v1342_v43 = vrot.slane %v1325_v23, %v2301_v35 }
 0x2e2   :  { %65 = vmax.xlane.f32.xlu1 %v64_v37 }
 0x2e3   :  { %v1348_v45 = vsel %vm1347_vm6, %v1330_v40, -inf  ;;  %v1349_v46 = vsel %vm1347_vm6, %v1334_v41, -inf  ;;  %v1350_v47 = vsel %vm1347_vm6, %v1338_v42, -inf  ;;  %v1351_v48 = vsel %vm1347_vm6, %v1342_v43, -inf }
 0x2e4   :  { %v1352_v14 = vmax.f32 %v1348_v45, %v1349_v46  ;;  %v1353_v49 = vmax.f32 %v1350_v47, %v1351_v48 }
 0x2e6   :  { %v1354_v50 = vmax.f32 %v1352_v14, %v1353_v49 }
 0x2e8   :  { %1355 = vmax.xlane.f32.xlu0 %v1354_v50 }
 0x367   :  { %v906_v60 = vpop.xlane.xlu1 %905 }
 0x368   :  { %v914_v2 = vrot.slane %v906_v60, %v2314_v59 }
 0x36a   :  { %v916_v39 = vsub.f32 %v875_v18, %v914_v2 }
 0x36b   :  { %v66_v3 = vpop.xlane.xlu1 %65 }
 0x36c   :  { %v917_v5 = vmul.f32 1.442695, %v916_v39  ;;  %v74_v7 = vrot.slane %v66_v3, %v2314_v59 }
 0x36e   :  { %1687 = vpow2.f32 %v917_v5  ;;  %v76_v9 = vsub.f32 %v2242_v55, %v74_v7 }
 0x370   :  { %v77_v32 = vmul.f32 1.442695, %v76_v9 }
 0x371   :  { %v1356_v61 = vpop.xlane.xlu0 %1355 }
 0x372   :  { %1689 = vpow2.f32 %v77_v32  ;;  %v1364_v20 = vrot.slane %v1356_v61, %v2314_v59 }
 0x374   :  { %v1366_v21 = vsub.f32 %v1325_v23, %v1364_v20 }
 0x376   :  { %v1367_v51 = vmul.f32 1.442695, %v1366_v21 }
 0x378   :  { %1691 = vpow2.f32 %v1367_v51 }
 0x37b   :  { %v1688_v16 = vpop.eup %1687 }
 0x37c   :  { %v2322_v25 = vsel %vm852_vm3, %v1688_v16, 0.0 }
 0x37d   :  { %v924_v18 = vrot.slane %v2322_v25, %v2264_v11  ;;  %v928_v44 = vrot.slane %v2322_v25, %v2267_v62  ;;  %v932_v55 = vrot.slane %v2322_v25, %v2270_v0  ;;  %v936_v53 = vrot.slane %v2322_v25, %v2273_v1 }
 0x37f   :  { %v2330_v10 = vpop.eup %1689  ;;  %v941_v38 = vsel %vm897_vm5, %v924_v18, 0.0  ;;  %v942_v26 = vsel %vm897_vm5, %v928_v44, 0.0  ;;  %v944_v15 = vsel %vm897_vm5, %v932_v55, 0.0  ;;  %v946_v36 = vsel %vm897_vm5, %v936_v53, 0.0 }
 0x380   :  { %v943_v31 = vadd.f32 %v942_v26, %v941_v38  ;;  %v80_v63 = vcombine.high %v2330_v10, %v2330_v10  ;;  %v87_v13 = vrot.slane %v2330_v10, %v2250_v24 }
 0x382   :  { %v945_v19 = vadd.f32 %v944_v15, %v943_v31  ;;  %v94_v27 = vrot.slane %v80_v63, %v2250_v24  ;;  %v95_v28 = vcombine.high %v87_v13, %v87_v13  ;;  %v101_v29 = vsel %vm57_vm4, %v87_v13, 0.0 }
 0x384   :  { %v947_v37 = vadd.f32 %v946_v36, %v945_v19  ;;  %v96_v23 = vcombine.high %v94_v27, %v94_v27  ;;  %v102_v40 = vsel %vm57_vm4, %v95_v28, 0.0  ;;  %v104_v41 = vsel %vm57_vm4, %v94_v27, 0.0 }
 0x385   :  { %v1692_v42 = vpop.eup %1691  ;;  %v103_v43 = vadd.f32 %v102_v40, %v101_v29 }
 0x386   :  { %948 = vadd.xlane.f32.xlu0 %v947_v37  ;;  %v106_v45 = vsel %vm57_vm4, %v96_v23, 0.0  ;;  %v1369_v46 = vsel %vm852_vm3, %v1692_v42, 0.0 }
 0x387   :  { %v105_v24 = vadd.f32 %v104_v41, %v103_v43  ;;  %v1374_v47 = vrot.slane %v1369_v46, %v2292_v22  ;;  %v1378_v48 = vrot.slane %v1369_v46, %v2295_v30  ;;  %v1382_v14 = vrot.slane %v1369_v46, %v2298_v33 }
 0x388   :  { %v1386_v50 = vrot.slane %v1369_v46, %v2301_v35 }
 0x389   :  { %v107_v49 = vadd.f32 %v106_v45, %v105_v24  ;;  %v1391_v52 = vsel %vm1347_vm6, %v1374_v47, 0.0  ;;  %v1392_v56 = vsel %vm1347_vm6, %v1378_v48, 0.0  ;;  %v1394_v58 = vsel %vm1347_vm6, %v1382_v14, 0.0 }
 0x38a   :  { %v1393_v57 = vadd.f32 %v1392_v56, %v1391_v52  ;;  %v1396_v60 = vsel %vm1347_vm6, %v1386_v50, 0.0 }
 0x38b   :  { %108 = vadd.xlane.f32.xlu0 %v107_v49 }
 0x38c   :  { %v1395_v17 = vadd.f32 %v1394_v58, %v1393_v57 }
 0x38e   :  { %v1397_v2 = vadd.f32 %v1396_v60, %v1395_v17 }
 0x390   :  { %1398 = vadd.xlane.f32.xlu1 %v1397_v2 }
 0x3a1   :  { %304 = vperm.xlu1 %1681, %v2109_v6  }
 0x3a5   :  { %1683 = vset.pattern.permute.xlu1 %v1743_v54 }
 0x40f   :  { %v2360_v9 = vpop.xlane.xlu0 %948 }
 0x410   :  { %v950_v51 = vmax.f32 %v2360_v9, 1e-30  ;;  %vm962_vm8 = vcmp.gt.f32.partialorder %v2360_v9, 0.0 }
 0x414   :  { %v109_v21 = vpop.xlane.xlu0 %108 }
 0x419   :  { %v1399_v39 = vpop.xlane.xlu1 %1398 }
 0x41a   :  { %v1400_v61 = vmax.f32 %v1399_v39, 1e-30  ;;  %vm1412_vm7 = vcmp.gt.f32.partialorder %v1399_v39, 0.0 }
 0x41d   :  { %v305_v3 = vpop.permute.xlu1 %304 }
 0x41e   :  { %v380_v5 = vadd.f32 %v2113_v8, %v305_v3 }
 0x420   :  { %v1578_v7 = vmul.f32 -1.442695, %v380_v5 }
 0x422   :  { %1693 = vpow2.f32 %v1578_v7 }
 0x42f   :  { %v1694_v32 = vpop.eup %1693 }
 0x430   :  { %v386_v20 = vadd.f32 1.0, %v1694_v32 }
 0x432   :  { %1695 = vrcp.f32 %v386_v20 }
 0x433   :  { %1697 = vrcp.f32 %v1400_v61 }
 0x434   :  { %1699 = vrcp.f32 %v109_v21 }
 0x435   :  { %1701 = vrcp.f32 %v950_v51 }
 0x43f   :  { %v1696_v6 = vpop.eup %1695 }
 0x440   :  { %v1698_v54 = vpop.eup %1697  ;;  %1013 = vperm.xlu0 %1682, %v1696_v6   ;;  %v1020_v16 = vsub.f32 1.0, %v1696_v6 }
 0x441   :  { %v1700_v18 = vpop.eup %1699  ;;  %v1409_v8 = vrot.slane %v1698_v54, %v2314_v59 }
 0x442   :  { %1023 = vperm.xlu1 %1683, %v1020_v16   ;;  %v118_v44 = vrot.slane %v1700_v18, %v2314_v59  ;;  %v1702_v53 = vpop.eup %1701 }
 0x443   :  { %v1411_v55 = vmul.f32 %v1409_v8, %v1369_v46  ;;  %v959_v63 = vrot.slane %v1702_v53, %v2314_v59 }
 0x444   :  { %1685 = vset.pattern.permute.xlu0 %v1741_v4  ;;  %v120_v38 = vmul.f32 %v2330_v10, %v118_v44 }
 0x445   :  { %v1419_v26 = vrot.slane %v1411_v55, %v2292_v22  ;;  %v1423_v31 = vrot.slane %v1411_v55, %v2295_v30  ;;  %v961_v19 = vmul.f32 %v959_v63, %v2322_v25  ;;  %v1427_v27 = vrot.slane %v1411_v55, %v2298_v33 }
 0x446   :  { %1684 = vset.pattern.permute.xlu1 %v1741_v4  ;;  %v2372_v13 = vrot.slane %v120_v38, %v2292_v22  ;;  %v2375_v15 = vrot.slane %v120_v38, %v2295_v30  ;;  %v990_v59 = vrot.slane %v120_v38, %v2264_v11  ;;  %v994_v28 = vrot.slane %v120_v38, %v2267_v62 }
 0x447   :  { %v2394_v29 = vrot.slane %v120_v38, %v2298_v33  ;;  %v969_v36 = vrot.slane %v961_v19, %v2264_v11  ;;  %v973_v37 = vrot.slane %v961_v19, %v2267_v62  ;;  %v1431_v25 = vrot.slane %v1411_v55, %v2301_v35 }
 0x448   :  { %v2379_v4 = vsel %vm1412_vm7, %v1419_v26, %v2372_v13  ;;  %v2383_v10 = vsel %vm1412_vm7, %v1423_v31, %v2375_v15  ;;  %v2409_v42 = vrot.slane %v120_v38, %v2301_v35  ;;  %v998_v62 = vrot.slane %v120_v38, %v2270_v0 }
 0x449   :  { %v1492_v22 = vsel %vm1347_vm6, %v2379_v4, 0.0  ;;  %v1493_v30 = vsel %vm1347_vm6, %v2383_v10, 0.0  ;;  %v2402_v23 = vsel %vm1412_vm7, %v1427_v27, %v2394_v29  ;;  %v1007_v41 = vsel %vm962_vm8, %v969_v36, %v990_v59 }
 0x44a   :  { %v1494_v40 = vadd.f32 %v1493_v30, %v1492_v22  ;;  %v1008_v33 = vsel %vm962_vm8, %v973_v37, %v994_v28  ;;  %v1495_v11 = vsel %vm1347_vm6, %v2402_v23, 0.0  ;;  %v1459_v43 = vsel %vm1412_vm7, %v1431_v25, %v2409_v42 }
 0x44b   :  { %v1034_v46 = vsel %vm897_vm5, %v1007_v41, 0.0  ;;  %v1035_v24 = vsel %vm897_vm5, %v1008_v33, 0.0  ;;  %v977_v47 = vrot.slane %v961_v19, %v2270_v0  ;;  %v1497_v48 = vsel %vm1347_vm6, %v1459_v43, 0.0 }
 0x44c   :  { %v1496_v45 = vadd.f32 %v1495_v11, %v1494_v40  ;;  %v1002_v35 = vrot.slane %v120_v38, %v2273_v1  ;;  %v1036_v49 = vadd.f32 %v1035_v24, %v1034_v46  ;;  %v981_v52 = vrot.slane %v961_v19, %v2273_v1 }
 0x44d   :  { %v1009_v14 = vsel %vm962_vm8, %v977_v47, %v998_v62  ;;  %v1468_v63 = vrot.slane %v2379_v4, 1  ;;  %v1469_v19 = vrot.slane %v2383_v10, 1  ;;  %v1470_v27 = vrot.slane %v2402_v23, 1 }
 0x44e   :  { %v1498_v50 = vadd.f32 %v1497_v48, %v1496_v45  ;;  %v1037_v56 = vsel %vm897_vm5, %v1009_v14, 0.0  ;;  %v1010_v57 = vsel %vm962_vm8, %v981_v52, %v1002_v35  ;;  %v1471_v22 = vrot.slane %v1459_v43, 1 }
 0x44f   :  { %v1038_v58 = vadd.f32 %v1037_v56, %v1036_v49  ;;  %v1039_v0 = vsel %vm897_vm5, %v1010_v57, 0.0  ;;  %v1750_v43 = vmov 1966171168  }
 0x450   :  { %v1069_v45 = vunpack.c.l.s4 %v1750_v43 }
 0x451   :  { %v1040_v17 = vadd.f32 %v1039_v0, %v1038_v58 }
 0x452   :  { %v1070_v58 = vunpack.c.0.s8 %v1069_v45 }
 0x45f   :  { %1499 = vadd.xlane.f32.xlu0 %v1498_v50 }
 0x466   :  { %1041 = vadd.xlane.f32.xlu1 %v1040_v17 }
 0x477   :  { %1461 = vperm.xlu1 %1684, %v1696_v6  }
 0x47b   :  { %1481 = vperm.xlu1 %1684, %v1020_v16  }
 0x4bb   :  { %v1014_v2 = vpop.permute.xlu0 %1013 }
 0x4bc   :  { %v1016_v1 = vmul.f32 %v1014_v2, %v1007_v41  ;;  %v1017_v32 = vmul.f32 %v1014_v2, %v1008_v33  ;;  %v1018_v61 = vmul.f32 %v1014_v2, %v1009_v14  ;;  %v1019_v20 = vmul.f32 %v1014_v2, %v1010_v57 }
 0x4bd   :  { %v1024_v60 = vpop.permute.xlu1 %1023 }
 0x4be   :  { %v1026_v39 = vmul.f32 %v1024_v60, %v990_v59  ;;  %v1027_v3 = vmul.f32 %v1024_v60, %v994_v28  ;;  %v1028_v5 = vmul.f32 %v1024_v60, %v998_v62  ;;  %v1029_v7 = vmul.f32 %v1024_v60, %v1002_v35 }
 0x4c0   :  { %v1030_v21 = vadd.f32 %v1026_v39, %v1016_v1  ;;  %v1031_v9 = vadd.f32 %v1027_v3, %v1017_v32  ;;  %v1032_v51 = vadd.f32 %v1028_v5, %v1018_v61  ;;  %v1033_v54 = vadd.f32 %v1029_v7, %v1019_v20 }
 0x4e8   :  { %v1500_v10 = vpop.xlane.xlu0 %1499 }
 0x4e9   :  { %vm1501_vm10 = vcmp.lt.f32.partialorder %v1500_v10, 0.5 }
 0x4ef   :  { %v1042_v18 = vpop.xlane.xlu1 %1041 }
 0x4f0   :  { %vm1043_vm9 = vcmp.lt.f32.partialorder %v1042_v18, 0.5 }
 0x4f1   :  { %v1046_v8 = vsel %vm1043_vm9, %v990_v59, %v1030_v21  ;;  %v1047_v44 = vsel %vm1043_vm9, %v994_v28, %v1031_v9  ;;  %v1048_v6 = vsel %vm1043_vm9, %v998_v62, %v1032_v51  ;;  %v1049_v16 = vsel %vm1043_vm9, %v1002_v35, %v1033_v54 }
 0x4f2   :  { %v1050_v55 = vadd.f32 1e-08, %v1046_v8  ;;  %v1051_v53 = vadd.f32 1e-08, %v1047_v44  ;;  %v1052_v38 = vadd.f32 1e-08, %v1048_v6 }
 0x4f3   :  { %v1053_v26 = vadd.f32 1e-08, %v1049_v16  ;;  %v1462_v31 = vpop.permute.xlu1 %1461 }
 0x4f4   :  { %1703 = vlog2.f32 %v1050_v55  ;;  %v1476_v30 = vmul.f32 %v1468_v63, %v1462_v31  ;;  %v1477_v59 = vmul.f32 %v1469_v19, %v1462_v31  ;;  %v1478_v28 = vmul.f32 %v1470_v27, %v1462_v31 }
 0x4f5   :  { %1705 = vlog2.f32 %v1051_v53  ;;  %v1479_v36 = vmul.f32 %v1471_v22, %v1462_v31 }
 0x4f6   :  { %1707 = vlog2.f32 %v1052_v38 }
 0x4f7   :  { %1709 = vlog2.f32 %v1053_v26  ;;  %v1482_v37 = vpop.permute.xlu1 %1481 }
 0x4f8   :  { %v1484_v25 = vmul.f32 %v1482_v37, %v2372_v13  ;;  %v1485_v40 = vmul.f32 %v1482_v37, %v2375_v15  ;;  %v1486_v4 = vmul.f32 %v1482_v37, %v2394_v29  ;;  %v1487_v41 = vmul.f32 %v1482_v37, %v2409_v42 }
 0x4fa   :  { %v1488_v33 = vadd.f32 %v1484_v25, %v1476_v30  ;;  %v1489_v23 = vadd.f32 %v1485_v40, %v1477_v59  ;;  %v1490_v11 = vadd.f32 %v1486_v4, %v1478_v28  ;;  %v1491_v62 = vadd.f32 %v1487_v41, %v1479_v36 }
 0x4fc   :  { %v1508_v46 = vrot.slane %v1488_v33, 7  ;;  %v1509_v24 = vrot.slane %v1489_v23, 7  ;;  %v1510_v47 = vrot.slane %v1490_v11, 7  ;;  %v1511_v48 = vrot.slane %v1491_v62, 7 }
 0x4fe   :  { %v1516_v35 = vsel %vm1501_vm10, %v2372_v13, %v1508_v46  ;;  %v1517_v14 = vsel %vm1501_vm10, %v2375_v15, %v1509_v24  ;;  %v1518_v49 = vsel %vm1501_vm10, %v2394_v29, %v1510_v47  ;;  %v1519_v50 = vsel %vm1501_vm10, %v2409_v42, %v1511_v48 }
 0x4ff   :  { %v1520_v52 = vadd.f32 1e-08, %v1516_v35  ;;  %v1521_v56 = vadd.f32 1e-08, %v1517_v14  ;;  %v1522_v57 = vadd.f32 1e-08, %v1518_v49  ;;  %v1073_v13 = vsub.s32 %v1070_v58, %v2245_v34 }
 0x500   :  { %v1523_v0 = vadd.f32 1e-08, %v1519_v50 }
 0x501   :  { %v1704_v17 = vpop.eup %1703  ;;  %1711 = vlog2.f32 %v1520_v52 }
 0x502   :  { %v1706_v60 = vpop.eup %1705  ;;  %v1055_v2 = vmul.f32 0.6931472, %v1704_v17  ;;  %1713 = vlog2.f32 %v1521_v56 }
 0x503   :  { %v1708_v39 = vpop.eup %1707  ;;  %v1057_v3 = vmul.f32 0.6931472, %v1706_v60  ;;  %1715 = vlog2.f32 %v1522_v57 }
 0x504   :  { %v1710_v15 = vpop.eup %1709  ;;  %v1059_v5 = vmul.f32 0.6931472, %v1708_v39  ;;  %1717 = vlog2.f32 %v1523_v0 }
 0x505   :  { %v1061_v29 = vmul.f32 0.6931472, %v1710_v15  ;;  %v1066_v42 = vcombine.low %v1055_v2, %v1057_v3 }
 0x507   :  { %v1067_v7 = vcombine.low %v1059_v5, %v1061_v29  ;;  %v1074_v1 = vrot.slane %v1066_v42, %v1073_v13 }
 0x509   :  { %v1081_v32 = vrot.slane %v1067_v7, %v1073_v13 }
 0x50b   :  { %v1082_v61 = vcombine.low %v1074_v1, %v1081_v32 }
 0x50d   :  { %v1089_v21 = vrot.slane %v1082_v61, %v1073_v13 }
 0x50e   :  { %v1712_v9 = vpop.eup %1711 }
 0x50f   :  { %v1714_v51 = vpop.eup %1713  ;;  %1095 = vst.msk [vmem:[#allocation2] ss:$2 sm:$0xf] %vm2441_vm11, %v1089_v21  ;;  %v1525_v34 = vmul.f32 0.6931472, %v1712_v9 }
 0x510   :  { %v1716_v54 = vpop.eup %1715  ;;  %v1527_v18 = vmul.f32 0.6931472, %v1714_v51 }
 0x511   :  { %v1718_v8 = vpop.eup %1717  ;;  %v1529_v44 = vmul.f32 0.6931472, %v1716_v54 }
 0x512   :  { %v1531_v6 = vmul.f32 0.6931472, %v1718_v8  ;;  %v1536_v16 = vcombine.low %v1525_v34, %v1527_v18 }
 0x514   :  { %v1537_v55 = vcombine.low %v1529_v44, %v1531_v6  ;;  %v1544_v53 = vrot.slane %v1536_v16, %v1073_v13 }
 0x516   :  { %v1551_v38 = vrot.slane %v1537_v55, %v1073_v13 }
 0x518   :  { %v1552_v12 = vcombine.high %v1544_v53, %v1551_v38 }
 0x51a   :  { %v1559_v26 = vrot.slane %v1552_v12, %v1073_v13 }
 0x51c   :  { %1562 = vst.msk [vmem:[#allocation2 + $0x1] ss:$2 sm:$0xf] %vm2441_vm11, %v1559_v26 }
 0x51d   :  { %1730 = shalt.err (!%p1727_p4)
}
 0x51e   :  { %1572 = dma.vmem_to_hbm [thread:$0]  %s1570_s16, 128, %s2459_s7, [#allocation3]  }
 0x51f   :  { %1739 = dma.done.wait [#allocation3], 128  }
 0x520   :  { %1740 = vsyncadd [#allocation3], 4294967168 }
 0x521   :  { %1576 = vsyncpa [#allocation3], 1 }

</bundles_post_ra>
